<compile_context>
chip_gen: v6e
topology: v6e:2x2x1
jax: 0.10.0
libtpu: 0.0.40
codegen_flags: <defaults>
</compile_context>

<pallas_src>
import jax
import jax.numpy as jnp
from jax.experimental import pallas as pl
from jax.experimental.pallas import tpu as pltpu

Z_DIM = 64
HIDDEN = 512
NUM_FEATURES = 1568
N_CHANNELS = 32
BN_EPS = 1e-5

NUM_FEATURES_PADDED = 1792          # 14 * 128 (lane-dense)
N_COL_BLOCKS = 2                    # megacore split of fc6 columns (v7x); serial loop elsewhere
COL_BLOCK = NUM_FEATURES_PADDED // N_COL_BLOCKS  # 896 = 7 * 128


def _batchnorm_train(h, gamma, beta):
    """Training-mode BatchNorm1d (per-batch mean, biased variance), one-pass stats."""
    inv_b = 1.0 / h.shape[0]
    mean = jnp.sum(h, axis=0, keepdims=True) * inv_b
    mean_sq = jnp.sum(h * h, axis=0, keepdims=True) * inv_b
    var = jnp.maximum(mean_sq - mean * mean, 0.0)
    inv = jax.lax.rsqrt(var + BN_EPS)
    return (h - mean) * inv * gamma + beta


def vgg_source_generator_kernel(x_ref, w1_ref, w5_ref, vec_ref, w6_ref, b6_ref, out_ref):
    x = x_ref[...]                       # (B, Z_DIM) f32
    vecs = vec_ref[...]                  # (8, HIDDEN) f32: [b1, g1, be1, b5, g5, be5, 0, 0]
    b1, g1, be1 = vecs[0:1, :], vecs[1:2, :], vecs[2:3, :]
    b5, g5, be5 = vecs[3:4, :], vecs[4:5, :], vecs[5:6, :]

    # fc1: Linear -> ReLU -> BatchNorm1d  (bf16 MXU operands, f32 accumulate + f32 elementwise)
    h = jnp.dot(x.astype(jnp.bfloat16), w1_ref[...],
                preferred_element_type=jnp.float32) + b1
    h = jnp.maximum(h, 0.0)
    h = _batchnorm_train(h, g1, be1)

    # fc5: Linear -> ReLU -> BatchNorm1d
    h = jnp.dot(h.astype(jnp.bfloat16), w5_ref[...],
                preferred_element_type=jnp.float32) + b5
    h = jnp.maximum(h, 0.0)
    h = _batchnorm_train(h, g5, be5)

    # fc6 (this grid step's 896-wide column block): Linear -> ReLU
    h = jnp.dot(h.astype(jnp.bfloat16), w6_ref[...],
                preferred_element_type=jnp.float32) + b6_ref[...]
    h = jnp.maximum(h, 0.0)
    out_ref[...] = h.astype(out_ref.dtype)


def pack_params(raw):
    """One-time conversion of PyTorch-style f32 params into kernel-ready arrays.

    Weights -> bf16; the six per-feature (512,) vectors -> one (8, 512) f32 array;
    w6/b6 lane-padded to 1792 columns.
    """
    vecs = jnp.zeros((8, HIDDEN), jnp.float32)
    for row, name in enumerate(("b1", "g1", "be1", "b5", "g5", "be5")):
        vecs = vecs.at[row].set(raw[name].reshape(HIDDEN))

    w6p = jnp.zeros((HIDDEN, NUM_FEATURES_PADDED), jnp.bfloat16)
    w6p = w6p.at[:, :NUM_FEATURES].set(raw["w6"].astype(jnp.bfloat16))
    b6p = jnp.zeros((1, NUM_FEATURES_PADDED), jnp.float32)
    b6p = b6p.at[0, :NUM_FEATURES].set(raw["b6"].reshape(NUM_FEATURES))

    return {
        "w1": raw["w1"].astype(jnp.bfloat16),
        "w5": raw["w5"].astype(jnp.bfloat16),
        "vecs": vecs,
        "w6": w6p,
        "b6": b6p,
    }


def vgg_source_generator_forward(x, kp):
    """x: (B, z_dim) float32 -> (B, n_channels, 7, 7) float32. kp = pack_params(raw)."""
    B = x.shape[0]
    const = lambda j: (0, 0)  # resident across grid steps (fetched once)

    flat = pl.pallas_call(
        vgg_source_generator_kernel,
        out_shape=jax.ShapeDtypeStruct((B, NUM_FEATURES_PADDED), jnp.float32),
        grid_spec=pltpu.PrefetchScalarGridSpec(
            num_scalar_prefetch=0,
            grid=(N_COL_BLOCKS,),
            in_specs=[
                pl.BlockSpec((B, Z_DIM), const),            # x
                pl.BlockSpec((Z_DIM, HIDDEN), const),       # w1 (bf16)
                pl.BlockSpec((HIDDEN, HIDDEN), const),      # w5 (bf16)
                pl.BlockSpec((8, HIDDEN), const),           # packed bias/BN vectors (f32)
                pl.BlockSpec((HIDDEN, COL_BLOCK), lambda j: (0, j)),  # w6 column block (bf16)
                pl.BlockSpec((1, COL_BLOCK), lambda j: (0, j)),       # b6 column block
            ],
            out_specs=pl.BlockSpec((B, COL_BLOCK), lambda j: (0, j)),
        ),
        compiler_params=pltpu.CompilerParams(
            dimension_semantics=("parallel",),
            vmem_limit_bytes=32 << 20,
        ),
    )(x, kp["w1"], kp["w5"], kp["vecs"], kp["w6"], kp["b6"])

    # h.view(b, n_channels, -1) -> (b, 32, 49) -> img_size = 7 -> (b, 32, 7, 7)
    img_size = int((NUM_FEATURES // N_CHANNELS) ** 0.5)
    return flat[:, :NUM_FEATURES].reshape(B, N_CHANNELS, img_size, img_size)


def init_params(key):
    """PyTorch-style raw f32 parameters (Linear weights stored as (in, out))."""
    ks = jax.random.split(key, 10)

    def lin_w(kw, fan_in, fan_out):
        scale = 1.0 / jnp.sqrt(jnp.float32(fan_in))
        return jax.random.normal(kw, (fan_in, fan_out), jnp.float32) * scale

    return {
        "w1": lin_w(ks[0], Z_DIM, HIDDEN),
        "b1": jax.random.normal(ks[1], (HIDDEN,), jnp.float32) * 0.02,
        "g1": 1.0 + jax.random.normal(ks[2], (HIDDEN,), jnp.float32) * 0.05,
        "be1": jax.random.normal(ks[3], (HIDDEN,), jnp.float32) * 0.05,
        "w5": lin_w(ks[4], HIDDEN, HIDDEN),
        "b5": jax.random.normal(ks[5], (HIDDEN,), jnp.float32) * 0.02,
        "g5": 1.0 + jax.random.normal(ks[6], (HIDDEN,), jnp.float32) * 0.05,
        "be5": jax.random.normal(ks[7], (HIDDEN,), jnp.float32) * 0.05,
        "w6": lin_w(ks[8], HIDDEN, NUM_FEATURES),
        "b6": jax.random.normal(ks[9], (NUM_FEATURES,), jnp.float32) * 0.02,
    }


def reference_forward(x, raw):
    """Pure-JAX reference with the same bf16-weight / f32-accumulate numerics."""
    def bn(h, g, b):
        mean = jnp.mean(h, axis=0, keepdims=True)
        var = jnp.mean((h - mean) ** 2, axis=0, keepdims=True)
        return (h - mean) * jax.lax.rsqrt(var + BN_EPS) * g + b

    h = jnp.dot(x.astype(jnp.bfloat16), raw["w1"].astype(jnp.bfloat16),
                preferred_element_type=jnp.float32) + raw["b1"][None, :]
    h = jnp.maximum(h, 0.0)
    h = bn(h, raw["g1"][None, :], raw["be1"][None, :])

    h = jnp.dot(h.astype(jnp.bfloat16), raw["w5"].astype(jnp.bfloat16),
                preferred_element_type=jnp.float32) + raw["b5"][None, :]
    h = jnp.maximum(h, 0.0)
    h = bn(h, raw["g5"][None, :], raw["be5"][None, :])

    h = jnp.dot(h.astype(jnp.bfloat16), raw["w6"].astype(jnp.bfloat16),
                preferred_element_type=jnp.float32) + raw["b6"][None, :]
    h = jnp.maximum(h, 0.0)

    B = x.shape[0]
    img_size = int((NUM_FEATURES // N_CHANNELS) ** 0.5)
    return h.reshape(B, N_CHANNELS, img_size, img_size)


if __name__ == "__main__":
    key = jax.random.PRNGKey(0)
    raw = init_params(key)
    kp = pack_params(raw)

    # TODO(synk): BatchNorm running-mean/var updates (training side effect) are not modeled;
    # forward matches PyTorch module in train() mode (per-batch stats). Requires B > 1.
    B = 4
    x = jax.random.normal(jax.random.fold_in(key, 999), (B, Z_DIM), jnp.float32)

    out = vgg_source_generator_forward(x, kp)
    out = jax.block_until_ready(out)

    assert out.shape == (B, N_CHANNELS, 7, 7), out.shape
    assert out.dtype == jnp.float32
    assert bool(jnp.all(out >= 0.0))  # ReLU output must be non-negative

    ref = jax.block_until_ready(reference_forward(x, raw))
    assert bool(jnp.allclose(out, ref, rtol=5e-3, atol=5e-3)), "kernel mismatch vs reference"

    print("KERNEL_OK")
</pallas_src>

<mosaic_0001>
module attributes {stable_mosaic.version = 11 : i64} {
  func.func @vgg_source_generator_kernel(%arg0: i32, %arg1: memref<4x64xf32, #tpu.memory_space<vmem>>, %arg2: memref<64x512xbf16, #tpu.memory_space<vmem>>, %arg3: memref<512x512xbf16, #tpu.memory_space<vmem>>, %arg4: memref<8x512xf32, #tpu.memory_space<vmem>>, %arg5: memref<512x896xbf16, #tpu.memory_space<vmem>>, %arg6: memref<1x896xf32, #tpu.memory_space<vmem>>, %arg7: memref<4x896xf32, #tpu.memory_space<vmem>>) attributes {dimension_semantics = [#tpu.dimension_semantics<parallel>], iteration_bounds = array<i64: 2>, scalar_prefetch = 0 : i64, scratch_operands = 0 : i64, tpu.core_type = #tpu.core_type<tc>, window_params = [{pipeline_mode = #tpu.pipeline_mode<synchronous>, transform_indices = @transform_0, window_bounds = array<i64: 4, 64>}, {pipeline_mode = #tpu.pipeline_mode<synchronous>, transform_indices = @transform_1, window_bounds = array<i64: 64, 512>}, {pipeline_mode = #tpu.pipeline_mode<synchronous>, transform_indices = @transform_2, window_bounds = array<i64: 512, 512>}, {pipeline_mode = #tpu.pipeline_mode<synchronous>, transform_indices = @transform_3, window_bounds = array<i64: 8, 512>}, {transform_indices = @transform_4, window_bounds = array<i64: 512, 896>}, {transform_indices = @transform_5, window_bounds = array<i64: 1, 896>}, {transform_indices = @transform_6, window_bounds = array<i64: 4, 896>}]} {
    %c0 = arith.constant 0 : index
    %c0_0 = arith.constant 0 : index
    %0 = vector.load %arg1[%c0, %c0_0] : memref<4x64xf32, #tpu.memory_space<vmem>>, vector<4x64xf32>
    %c0_1 = arith.constant 0 : index
    %c0_2 = arith.constant 0 : index
    %1 = vector.load %arg4[%c0_1, %c0_2] : memref<8x512xf32, #tpu.memory_space<vmem>>, vector<8x512xf32>
    %2 = vector.extract_strided_slice %1 {offsets = [0, 0], sizes = [1, 512], strides = [1, 1]} : vector<8x512xf32> to vector<1x512xf32>
    %3 = vector.extract_strided_slice %1 {offsets = [1, 0], sizes = [1, 512], strides = [1, 1]} : vector<8x512xf32> to vector<1x512xf32>
    %4 = vector.extract_strided_slice %1 {offsets = [2, 0], sizes = [1, 512], strides = [1, 1]} : vector<8x512xf32> to vector<1x512xf32>
    %5 = vector.extract_strided_slice %1 {offsets = [3, 0], sizes = [1, 512], strides = [1, 1]} : vector<8x512xf32> to vector<1x512xf32>
    %6 = vector.extract_strided_slice %1 {offsets = [4, 0], sizes = [1, 512], strides = [1, 1]} : vector<8x512xf32> to vector<1x512xf32>
    %7 = vector.extract_strided_slice %1 {offsets = [5, 0], sizes = [1, 512], strides = [1, 1]} : vector<8x512xf32> to vector<1x512xf32>
    %8 = arith.truncf %0 : vector<4x64xf32> to vector<4x64xbf16>
    %c0_3 = arith.constant 0 : index
    %c0_4 = arith.constant 0 : index
    %9 = vector.load %arg2[%c0_3, %c0_4] : memref<64x512xbf16, #tpu.memory_space<vmem>>, vector<64x512xbf16>
    %cst = arith.constant dense<0.000000e+00> : vector<4x512xf32>
    %10 = tpu.matmul %8, %9, %cst {dimension_numbers = #tpu.dot_dimension_numbers<[1], [0], [0], [1], [0, 0, 1, 1], [], []>} : vector<4x64xbf16>, vector<64x512xbf16>, vector<4x512xf32> -> vector<4x512xf32>
    %11 = vector.broadcast %2 : vector<1x512xf32> to vector<4x512xf32>
    %12 = arith.addf %10, %11 : vector<4x512xf32>
    %cst_5 = arith.constant 0.000000e+00 : f32
    %13 = vector.broadcast %cst_5 : f32 to vector<4x512xf32>
    %14 = arith.maximumf %12, %13 : vector<4x512xf32>
    %cst_6 = arith.constant dense<0.000000e+00> : vector<512xf32>
    %15 = vector.multi_reduction <add>, %14, %cst_6 [0] : vector<4x512xf32> to vector<512xf32>
    %16 = vector.shape_cast %15 : vector<512xf32> to vector<1x512xf32>
    %cst_7 = arith.constant 2.500000e-01 : f32
    %17 = vector.broadcast %cst_7 : f32 to vector<1x512xf32>
    %18 = arith.mulf %16, %17 : vector<1x512xf32>
    %19 = arith.mulf %14, %14 : vector<4x512xf32>
    %cst_8 = arith.constant dense<0.000000e+00> : vector<512xf32>
    %20 = vector.multi_reduction <add>, %19, %cst_8 [0] : vector<4x512xf32> to vector<512xf32>
    %21 = vector.shape_cast %20 : vector<512xf32> to vector<1x512xf32>
    %cst_9 = arith.constant 2.500000e-01 : f32
    %22 = vector.broadcast %cst_9 : f32 to vector<1x512xf32>
    %23 = arith.mulf %21, %22 : vector<1x512xf32>
    %24 = arith.mulf %18, %18 : vector<1x512xf32>
    %25 = arith.subf %23, %24 : vector<1x512xf32>
    %cst_10 = arith.constant 0.000000e+00 : f32
    %26 = vector.broadcast %cst_10 : f32 to vector<1x512xf32>
    %27 = arith.maximumf %25, %26 : vector<1x512xf32>
    %cst_11 = arith.constant 9.99999974E-6 : f32
    %28 = vector.broadcast %cst_11 : f32 to vector<1x512xf32>
    %29 = arith.addf %27, %28 : vector<1x512xf32>
    %30 = math.rsqrt %29 : vector<1x512xf32>
    %31 = vector.broadcast %18 : vector<1x512xf32> to vector<4x512xf32>
    %32 = arith.subf %14, %31 : vector<4x512xf32>
    %33 = vector.broadcast %30 : vector<1x512xf32> to vector<4x512xf32>
    %34 = arith.mulf %32, %33 : vector<4x512xf32>
    %35 = vector.broadcast %3 : vector<1x512xf32> to vector<4x512xf32>
    %36 = arith.mulf %34, %35 : vector<4x512xf32>
    %37 = vector.broadcast %4 : vector<1x512xf32> to vector<4x512xf32>
    %38 = arith.addf %36, %37 : vector<4x512xf32>
    %39 = arith.truncf %38 : vector<4x512xf32> to vector<4x512xbf16>
    %c0_12 = arith.constant 0 : index
    %c0_13 = arith.constant 0 : index
    %40 = vector.load %arg3[%c0_12, %c0_13] : memref<512x512xbf16, #tpu.memory_space<vmem>>, vector<512x512xbf16>
    %cst_14 = arith.constant dense<0.000000e+00> : vector<4x512xf32>
    %41 = tpu.matmul %39, %40, %cst_14 {dimension_numbers = #tpu.dot_dimension_numbers<[1], [0], [0], [1], [0, 0, 1, 1], [], []>} : vector<4x512xbf16>, vector<512x512xbf16>, vector<4x512xf32> -> vector<4x512xf32>
    %42 = vector.broadcast %5 : vector<1x512xf32> to vector<4x512xf32>
    %43 = arith.addf %41, %42 : vector<4x512xf32>
    %cst_15 = arith.constant 0.000000e+00 : f32
    %44 = vector.broadcast %cst_15 : f32 to vector<4x512xf32>
    %45 = arith.maximumf %43, %44 : vector<4x512xf32>
    %cst_16 = arith.constant dense<0.000000e+00> : vector<512xf32>
    %46 = vector.multi_reduction <add>, %45, %cst_16 [0] : vector<4x512xf32> to vector<512xf32>
    %47 = vector.shape_cast %46 : vector<512xf32> to vector<1x512xf32>
    %cst_17 = arith.constant 2.500000e-01 : f32
    %48 = vector.broadcast %cst_17 : f32 to vector<1x512xf32>
    %49 = arith.mulf %47, %48 : vector<1x512xf32>
    %50 = arith.mulf %45, %45 : vector<4x512xf32>
    %cst_18 = arith.constant dense<0.000000e+00> : vector<512xf32>
    %51 = vector.multi_reduction <add>, %50, %cst_18 [0] : vector<4x512xf32> to vector<512xf32>
    %52 = vector.shape_cast %51 : vector<512xf32> to vector<1x512xf32>
    %cst_19 = arith.constant 2.500000e-01 : f32
    %53 = vector.broadcast %cst_19 : f32 to vector<1x512xf32>
    %54 = arith.mulf %52, %53 : vector<1x512xf32>
    %55 = arith.mulf %49, %49 : vector<1x512xf32>
    %56 = arith.subf %54, %55 : vector<1x512xf32>
    %cst_20 = arith.constant 0.000000e+00 : f32
    %57 = vector.broadcast %cst_20 : f32 to vector<1x512xf32>
    %58 = arith.maximumf %56, %57 : vector<1x512xf32>
    %cst_21 = arith.constant 9.99999974E-6 : f32
    %59 = vector.broadcast %cst_21 : f32 to vector<1x512xf32>
    %60 = arith.addf %58, %59 : vector<1x512xf32>
    %61 = math.rsqrt %60 : vector<1x512xf32>
    %62 = vector.broadcast %49 : vector<1x512xf32> to vector<4x512xf32>
    %63 = arith.subf %45, %62 : vector<4x512xf32>
    %64 = vector.broadcast %61 : vector<1x512xf32> to vector<4x512xf32>
    %65 = arith.mulf %63, %64 : vector<4x512xf32>
    %66 = vector.broadcast %6 : vector<1x512xf32> to vector<4x512xf32>
    %67 = arith.mulf %65, %66 : vector<4x512xf32>
    %68 = vector.broadcast %7 : vector<1x512xf32> to vector<4x512xf32>
    %69 = arith.addf %67, %68 : vector<4x512xf32>
    %70 = arith.truncf %69 : vector<4x512xf32> to vector<4x512xbf16>
    %c0_22 = arith.constant 0 : index
    %c0_23 = arith.constant 0 : index
    %71 = vector.load %arg5[%c0_22, %c0_23] : memref<512x896xbf16, #tpu.memory_space<vmem>>, vector<512x896xbf16>
    %cst_24 = arith.constant dense<0.000000e+00> : vector<4x896xf32>
    %72 = tpu.matmul %70, %71, %cst_24 {dimension_numbers = #tpu.dot_dimension_numbers<[1], [0], [0], [1], [0, 0, 1, 1], [], []>} : vector<4x512xbf16>, vector<512x896xbf16>, vector<4x896xf32> -> vector<4x896xf32>
    %c0_25 = arith.constant 0 : index
    %c0_26 = arith.constant 0 : index
    %73 = vector.load %arg6[%c0_25, %c0_26] : memref<1x896xf32, #tpu.memory_space<vmem>>, vector<1x896xf32>
    %74 = vector.broadcast %73 : vector<1x896xf32> to vector<4x896xf32>
    %75 = arith.addf %72, %74 : vector<4x896xf32>
    %cst_27 = arith.constant 0.000000e+00 : f32
    %76 = vector.broadcast %cst_27 : f32 to vector<4x896xf32>
    %77 = arith.maximumf %75, %76 : vector<4x896xf32>
    %c0_28 = arith.constant 0 : index
    %c0_29 = arith.constant 0 : index
    %78 = vector.load %arg7[%c0_28, %c0_29] : memref<4x896xf32, #tpu.memory_space<vmem>>, vector<4x896xf32>
    tpu.vector_store %arg7[%c0_28, %c0_29], %77 {strides = array<i32>} : memref<4x896xf32, #tpu.memory_space<vmem>>, vector<4x896xf32>,
    return
  }
  func.func @transform_0(%arg0: i32) -> (i32, i32) {
    %c0_i32 = arith.constant 0 : i32
    %c0_i32_0 = arith.constant 0 : i32
    %c0_i32_1 = arith.constant 0 : i32
    return %c0_i32, %c0_i32_0 : i32, i32
  }
  func.func @transform_1(%arg0: i32) -> (i32, i32) {
    %c0_i32 = arith.constant 0 : i32
    %c0_i32_0 = arith.constant 0 : i32
    %c0_i32_1 = arith.constant 0 : i32
    return %c0_i32, %c0_i32_0 : i32, i32
  }
  func.func @transform_2(%arg0: i32) -> (i32, i32) {
    %c0_i32 = arith.constant 0 : i32
    %c0_i32_0 = arith.constant 0 : i32
    %c0_i32_1 = arith.constant 0 : i32
    return %c0_i32, %c0_i32_0 : i32, i32
  }
  func.func @transform_3(%arg0: i32) -> (i32, i32) {
    %c0_i32 = arith.constant 0 : i32
    %c0_i32_0 = arith.constant 0 : i32
    %c0_i32_1 = arith.constant 0 : i32
    return %c0_i32, %c0_i32_0 : i32, i32
  }
  func.func @transform_4(%arg0: i32) -> (i32, i32) {
    %c0_i32 = arith.constant 0 : i32
    %c0_i32_0 = arith.constant 0 : i32
    return %c0_i32, %arg0 : i32, i32
  }
  func.func @transform_5(%arg0: i32) -> (i32, i32) {
    %c0_i32 = arith.constant 0 : i32
    %c0_i32_0 = arith.constant 0 : i32
    return %c0_i32, %arg0 : i32, i32
  }
  func.func @transform_6(%arg0: i32) -> (i32, i32) {
    %c0_i32 = arith.constant 0 : i32
    %c0_i32_0 = arith.constant 0 : i32
    return %c0_i32, %arg0 : i32, i32
  }
}

</mosaic_0001>

<bundles_post_ra>
// kernel: tpu_custom_call.1
= control target key start
LH: loop header
LB: loop body
LE: loop exit
PB: predicated region body
PF: predicated region fallthrough
CT: control target
= control target key end

     0   :  { %s5752_s0 = inlined_call_operand.hbm [shape: f32[4,64], index: 0, kind: input, shape index: {}]   ;;  %s5753_s1 = inlined_call_operand.hbm [shape: bf16[64,512], index: 1, kind: input, shape index: {}]   ;;  %s5754_s2 = inlined_call_operand.hbm [shape: bf16[512,512], index: 2, kind: input, shape index: {}]   ;;  %s5755_s3 = inlined_call_operand.hbm [shape: f32[8,512], index: 3, kind: input, shape index: {}]   ;;  %s5756_s4 = inlined_call_operand.hbm [shape: bf16[512,1792], index: 4, kind: input, shape index: {}]   ;;  %s5757_s5 = inlined_call_operand.hbm [shape: f32[1,1792], index: 5, kind: input, shape index: {}]   ;;  %s5758_s6 = inlined_call_operand.hbm [shape: f32[4,1792], index: 6, kind: output, shape index: {}]  }
   0x1   :  { %5768 = sst [smem:[#allocation21_spill]] %s5752_s0 }
   0x2   :  { %11 = vsyncpa [#allocation3], 0 }
   0x3   :  { %12 = vsyncpa [#allocation6], 0 }
   0x4   :  { %13 = vsyncpa [#allocation9], 0 }
   0x5   :  { %14 = vsyncpa [#allocation4], 0 }
   0x6   :  { %16 = vsyncpa [#allocation4 + $0x1], 0  ;;  %s5116_s21 = smov 0   ;;  %s5118_s22 = smov 0  }
   0x7   :  { %s5120_s23 = smov 0   ;;  %s5122_s24 = smov 0  }
   0x8 LB: > { %s5137_s25 = sadd.s32 4294967295, %s5066_s24   ;;  %s3739_s26 = sadd.s32 4294967294, %s5066_s24   ;;  %s5066_s24 = sphi %s5122_s24, %s5796_s24   ;;  %s5062_s23 = sphi %s5120_s23, %s5800_s23   ;;  %s5058_s22 = sphi %s5118_s22, %s5799_s22   ;;  %s5054_s21 = sphi %s5116_s21, %s5798_s21  }
   0x9   : > { %s5141_s27 = sadd.s32 1, %s5066_s24   ;;  %s113_s28 = sadd.s32 1, %s5062_s23 }
   0xa   : > { %5769 = sst [smem:[#allocation18_spill]] %s5141_s27  ;;  %s110_s29 = ssub.s32 %s5066_s24, %s5141_s27 }
   0xb   : > { %p120_p0 = scmp.ne.s32.totalorder %s5062_s23, %s5058_s22  ;;  %p111_p1 = scmp.eq.s32.totalorder %s110_s29, 0 }
   0xc   : > { %p121_p2 = scmp.eq.s32.totalorder %s5066_s24, 0  ;;  %p126_p3 = scmp.ne.s32.totalorder %s5058_s22, %s5054_s21 }
   0xd   : > { %p5759_p4 = scmp.eq.s32.totalorder %s5137_s25, 0  ;;  %p176_p7 = scmp.eq.s32.totalorder %s5137_s25, 1 }
   0xe   : > { %s5153_s30 = scalar_select %p111_p1, %s5062_s23, %s113_s28  }
   0xf   : > { %p5155_p5 = por %p121_p2, %p120_p0  ;;  %p5161_p6 = por %p5759_p4, %p126_p3 }
  0x10   : > { %5770 = sst [smem:[#allocation19_spill]] %s5153_s30  ;;  %p182_p8 = scmp.eq.s32.totalorder %s3739_s26, 1 }
  0x11   : > { %s5772_s8 = scalar_select %p5161_p6, 1, 0 }
  0x12   : > { %p3740_p9 = scmp.ge.s32.totalorder %s5066_s24, 1  ;;  %p189_p10 = scmp.lt.s32.totalorder %s5066_s24, 3 }
  0x13   : > { %p5168_p11 = por %p176_p7, %p120_p0  ;;  %p5172_p12 = por %p182_p8, %p126_p3 }
  0x14   : > { %p5176_p13 = pnand %p3740_p9, %p189_p10  ;;  %s5068_s12 = smov [#allocation2]  }
  0x15   : > { %s5773_s9 = scalar_select %p5168_p11, 1, 0 }
  0x16   : > { %s5774_s10 = scalar_select %p5172_p12, 1, 0 }
  0x17   : > { %s5776_s11 = scalar_select %p5176_p13, 1, 0 }
  0x18   : > { %5775 = sst [smem:[#allocation20_spill]] %s5774_s10  ;;  %p4200_p2 = pneg %p5176_p13 }
  0x19   : > { %s202_s13 = sshll.u32 %s5068_s12, 4  ;;  %p4228_p4 = scmp.lt.s32.totalorder %s5066_s24, 2  ;;  %s203_s13 = int_to_ptr.vmem [resolvable:$true] %s202_s13 }
  0x1a   : > { %p5777_p0 = scmp.eq.s32.totalorder %s5137_s25, 0  ;;  %s5069_s16 = smov [#allocation5]  }
  0x1b   : > { %p5192_p3 = pnand %p4228_p4, %p5155_p5  ;;  %s212_s17 = sshll.u32 %s5069_s16, 4  ;;  %s213_s17 = int_to_ptr.vmem [resolvable:$true] %s212_s17 }
  0x1c   : > { %p5186_p7 = pnand %p4200_p2, %p5777_p0  ;;  %s4841_s18 = scalar_lea.vmem %s203_s13, 64 }
  0x1d   : > { %p4842_p9 = scmp.ne.s32.totalorder %s203_s13, %s4841_s18  ;;  %p4849_p0 = scmp.lt.s32.totalorder %s203_s13, %s203_s13 }
  0x1e   : > { %p5765_p8 = pneg %p5186_p7  ;;  %p4850_p1 = scmp.lt.s32.totalorder %s4841_s18, %s4841_s18 }
  0x20   : > { %p4844_p10 = pnand %p4842_p9, %p5765_p8  ;;  %p4851_p12 = por %p4850_p1, %p4849_p0 }
  0x22   : > { %p4845_p2 = pneg %p4844_p10 }
  0x24   : > { %p4852_p11 = pnand %p4851_p12, %p4845_p2 }
  0x26   : > { %4855 = shalt.err (!%p4852_p11)
}
  0x27   : > { %s5780_s0 = sld [smem:[#allocation21_spill]]  ;;  %s250_s26 = sand.u32 1, %s5066_s24  }
  0x28   : > { %s4867_s28 = scalar_lea.vmem %s213_s17, 2048  ;;  %p4875_p10 = scmp.lt.s32.totalorder %s213_s17, %s213_s17 }
  0x29   : > { %p4868_p4 = scmp.ne.s32.totalorder %s213_s17, %s4867_s28  ;;  %p4876_p6 = scmp.lt.s32.totalorder %s4867_s28, %s4867_s28 }
  0x2b   : > { %p4870_p5 = pnand %p4868_p4, %p5765_p8  ;;  %p4877_p1 = por %p4876_p6, %p4875_p10 }
  0x2d   : > { %4203 = dma.hbm_to_vmem [thread:$0]  (!%p5186_p7), %s5780_s0, 64, %s203_s13, [#allocation3]  }
  0x2e   : > { %p4871_p9 = pneg %p4870_p5 }
  0x30   : > { %p4878_p12 = pnand %p4877_p1, %p4871_p9 }
  0x32   : > { %4881 = shalt.err (!%p4878_p12)
}
  0x33   : > { %s5070_s29 = smov 256   ;;  %s5071_s7 = smov 16  }
  0x34   : > { %4206 = dma.hbm_to_vmem [thread:$0]  (!%p5186_p7), %s5753_s1, 2048, %s213_s17, [#allocation6], %s5070_s29, %s5070_s29, %s5071_s7  }
  0x35   : > { %s5767_s16 = sand.u32 1, %s5062_s23   ;;  %s4126_s19 = smul.u32 448, %s5066_s24 }
  0x36   : > { %s4173_s18 = smul.u32 1792, %s5767_s16  ;;  %s5229_s10 = scalar_lea.sflag [#allocation3], %s250_s26 }
  0x37   : > { %s5225_s0 = scalar_lea.hbm %s5756_s4, %s4126_s19  ;;  %p4884_p11 = pneg %p5192_p3 }
  0x38   : > { %s254_s30 = scalar_lea.vmem [#allocation10], %s4173_s18  ;;  %s4882_s12 = scalar_lea.hbm %s5225_s0, 28672 }
  0x39   : > { %s261_s27 = sshll.u32 %s254_s30, 4  ;;  %p4883_p6 = scmp.ne.s32.totalorder %s5225_s0, %s4882_s12  ;;  %s5227_s27 = int_to_ptr.vmem [resolvable:$true] %s261_s27 }
  0x3a   : > { %s4887_s19 = scalar_lea.hbm %s5756_s4, 57344  ;;  %p4888_p4 = scmp.lt.s32.totalorder %s5225_s0, %s5756_s4 }
  0x3b   : > { %p4885_p2 = pnand %p4884_p11, %p4883_p6  ;;  %p4889_p5 = scmp.lt.s32.totalorder %s4887_s19, %s4882_s12 }
  0x3d   : > { %p4886_p0 = pneg %p4885_p2  ;;  %p4890_p9 = por %p4889_p5, %p4888_p4 }
  0x3f   : > { %p4891_p10 = pnand %p4890_p9, %p4886_p0 }
  0x41   : > { %4894 = shalt.err (!%p4891_p10)
}
  0x42   : > { %s4895_s30 = scalar_lea.vmem %s5227_s27, 28672  ;;  %s5072_s26 = smov [#allocation10]  }
  0x43   : > { %p4896_p1 = scmp.ne.s32.totalorder %s5227_s27, %s4895_s30  ;;  %s4900_s18 = sshll.u32 %s5072_s26, 4  ;;  %s4901_s18 = int_to_ptr.vmem [resolvable:$false] %s4900_s18 }
  0x44   : > { %s4902_s17 = scalar_lea.vmem %s4901_s18, 57344  ;;  %p4903_p2 = scmp.lt.s32.totalorder %s5227_s27, %s4901_s18 }
  0x45   : > { %p4898_p12 = pnand %p4896_p1, %p4884_p11  ;;  %p4904_p8 = scmp.lt.s32.totalorder %s4902_s17, %s4895_s30 }
  0x47   : > { %p4899_p6 = pneg %p4898_p12  ;;  %p4905_p13 = por %p4904_p8, %p4903_p2 }
  0x49   : > { %p4906_p4 = pnand %p4905_p13, %p4899_p6 }
  0x4b   : > { %4909 = shalt.err (!%p4906_p4)
}
  0x4c   : > { %s5073_s12 = smov 896   ;;  %s5074_s13 = smov 448  }
  0x4d   : > { %s5075_s19 = smov 28   ;;  %s5076_s20 = smov [#allocation7]  }
  0x4e   : > { %4216 = dma.hbm_to_vmem [thread:$0]  (!%p5192_p3), %s5225_s0, 28672, %s5227_s27, %s5229_s10, %s5073_s12, %s5074_s13, %s5075_s19  }
  0x4f   : > { %s225_s28 = sshll.u32 %s5076_s20, 4  ;;  %s5077_s26 = smov [#allocation8]   ;;  %s226_s28 = int_to_ptr.vmem [resolvable:$true] %s225_s28 }
  0x50   : > { %s239_s16 = sshll.u32 %s5077_s26, 4  ;;  %s4921_s18 = scalar_lea.vmem %s226_s28, 16384  ;;  %s240_s16 = int_to_ptr.vmem [resolvable:$true] %s239_s16 }
  0x51   : > { %p4922_p0 = scmp.ne.s32.totalorder %s226_s28, %s4921_s18  ;;  %p5781_p13 = pneg %p5186_p7 }
  0x52   : > { %p4929_p9 = scmp.lt.s32.totalorder %s226_s28, %s226_s28  ;;  %p4930_p10 = scmp.lt.s32.totalorder %s4921_s18, %s4921_s18 }
  0x53   : > { %p4924_p8 = pnand %p4922_p0, %p5781_p13 }
  0x54   : > { %p4931_p1 = por %p4930_p10, %p4929_p9 }
  0x55   : > { %p4925_p5 = pneg %p4924_p8 }
  0x57   : > { %p4932_p12 = pnand %p4931_p1, %p4925_p5 }
  0x59   : > { %4935 = shalt.err (!%p4932_p12)
}
  0x5a   : > { %4209 = dma.hbm_to_vmem [thread:$0]  (!%p5186_p7), %s5754_s2, 16384, %s226_s28, [#allocation6], %s5070_s29, %s5070_s29, %s5071_s7  }
  0x5b   : > { %s5782_s30 = sand.u32 1, %s5062_s23   ;;  %s4947_s12 = scalar_lea.vmem %s240_s16, 512 }
  0x5c   : > { %s4174_s17 = smul.u32 7, %s5782_s30  ;;  %p4948_p6 = scmp.ne.s32.totalorder %s240_s16, %s4947_s12 }
  0x5d   : > { %p5783_p2 = pmov %p5781_p13  ;;  %p4955_p13 = scmp.lt.s32.totalorder %s240_s16, %s240_s16 }
  0x5e   : > { %p4956_p8 = scmp.lt.s32.totalorder %s4947_s12, %s4947_s12 }
  0x5f   : > { %p4950_p4 = pnand %p4948_p6, %p5783_p2 }
  0x60   : > { %p4957_p5 = por %p4956_p8, %p4955_p13 }
  0x61   : > { %p4951_p0 = pneg %p4950_p4 }
  0x63   : > { %p4958_p9 = pnand %p4957_p5, %p4951_p0 }
  0x65   : > { %4961 = shalt.err (!%p4958_p9)
}
  0x66   : > { %4212 = dma.hbm_to_vmem [thread:$0]  (!%p5186_p7), %s5755_s3, 512, %s240_s16, [#allocation9]  }
  0x67   : > { %s4127_s29 = smul.u32 112, %s5066_s24  ;;  %s275_s7 = scalar_lea.vmem [#allocation11], %s4174_s17 }
  0x68   : > { %s283_s20 = sshll.u32 %s275_s7, 4  ;;  %s4967_s30 = scalar_lea.hbm %s5757_s5, 224  ;;  %s284_s20 = int_to_ptr.vmem [resolvable:$true] %s283_s20 }
  0x69   : > { %s281_s18 = scalar_lea.hbm %s5757_s5, %s4127_s29 }
  0x6a   : > { %s4962_s0 = scalar_lea.hbm %s281_s18, 112  ;;  %p4968_p7 = scmp.lt.s32.totalorder %s281_s18, %s5757_s5 }
  0x6b   : > { %p4963_p10 = scmp.ne.s32.totalorder %s281_s18, %s4962_s0  ;;  %p4969_p6 = scmp.lt.s32.totalorder %s4967_s30, %s4962_s0 }
  0x6d   : > { %p4965_p1 = pnand %p4963_p10, %p4884_p11  ;;  %p4970_p2 = por %p4969_p6, %p4968_p7 }
  0x6f   : > { %p4966_p12 = pneg %p4965_p1 }
  0x71   : > { %p4971_p4 = pnand %p4970_p2, %p4966_p12 }
  0x73   : > { %4974 = shalt.err (!%p4971_p4)
}
  0x74   : > { %s4975_s17 = scalar_lea.vmem %s284_s20, 112  ;;  %s5078_s13 = smov [#allocation11]  }
  0x75   : > { %p4976_p0 = scmp.ne.s32.totalorder %s284_s20, %s4975_s17  ;;  %s4980_s19 = sshll.u32 %s5078_s13, 4  ;;  %s4981_s19 = int_to_ptr.vmem [resolvable:$false] %s4980_s19 }
  0x76   : > { %s4982_s29 = scalar_lea.vmem %s4981_s19, 224  ;;  %p4983_p5 = scmp.lt.s32.totalorder %s284_s20, %s4981_s19 }
  0x77   : > { %p4978_p13 = pnand %p4976_p0, %p4884_p11  ;;  %p4984_p9 = scmp.lt.s32.totalorder %s4982_s29, %s4975_s17 }
  0x79   : > { %p4979_p8 = pneg %p4978_p13  ;;  %p4985_p10 = por %p4984_p9, %p4983_p5 }
  0x7b   : > { %p4986_p1 = pnand %p4985_p10, %p4979_p8 }
  0x7d   : > { %4989 = shalt.err (!%p4986_p1)
}
  0x7e   : > { %4219 = dma.hbm_to_vmem [thread:$0]  (!%p5192_p3), %s281_s18, 112, %s284_s20, %s5229_s10  }
  0x7f   : > { %p5784_p12 = scmp.ne.s32.totalorder %s5776_s11, 0 }
  0x80   : > { %p5785_p7 = scmp.eq.s32.totalorder (!%p5784_p12), %s5137_s25, 0 }
  0x81   : > { %292 = sbr.rel (%p5784_p12) target bundleno = 1098 (0x44a), region = 44 }
  0x86   : > { %5033 = dma.done.wait (%p5785_p7), [#allocation3], 64   ;;  %p5786_p11 = pmov %p5785_p7 }
  0x87   : > { %p5787_p6 = pmov %p5785_p7 }
  0x88   : > { %5035 = vsyncadd (%p5786_p11), [#allocation3], 4294967232 }
  0x89   : > { %5037 = dma.done.wait (%p5787_p6), [#allocation6], 18432   ;;  %p5788_p2 = pmov %p5787_p6 }
  0x8b   : > { %5039 = vsyncadd (%p5788_p2), [#allocation6], 4294948864  ;;  %p5789_p4 = pmov %p5788_p2 }
  0x8c   : > { %p5790_p3 = pmov %p5788_p2 }
  0x8d   : > { %5041 = dma.done.wait (%p5789_p4), [#allocation9], 512  }
  0x8e   : > { %5043 = vsyncadd (%p5790_p3), [#allocation9], 4294966784  ;;  %s310_s10 = sand.u32 1, %s5137_s25   ;;  %s5312_s11 = sand.u32 1, %s5058_s22  }
  0x8f   : > { %s4175_s15 = smul.u32 1792, %s5312_s11  ;;  %s311_s7 = scalar_lea.sflag [#allocation3], %s310_s10 }
  0x90   : > { %p5791_p0 = scmp.ne.s32.totalorder %s5772_s8, 0 }
  0x91   : > { %s5315_s20 = scalar_lea.vmem [#allocation10], %s4175_s15 }
  0x92   : > { %5045 = dma.done.wait (%p5791_p0), %s311_s7, 28784  }
  0x93   : > { %5047 = vsyncadd (%p5791_p0), %s311_s7, 4294938512  ;;  %v5079_v0 = vmov 0   ;;  %v4276_v1 = vld [vmem:[#allocation5 + $0x64] ss:$16 sps:$4 sm:$0xff]   ;;  %v4278_v2 = vld [vmem:[#allocation5 + $0x6c] ss:$16 sps:$4 sm:$0xff]  }
  0x94   : > { %515 = vmatprep.mubr.bf16.mxu0 %v5079_v0  ;;  %556 = vmatprep.mubr.bf16.mxu1 %v5079_v0  ;;  %v4280_v3 = vld [vmem:[#allocation5 + $0x60] ss:$16 sps:$4 sm:$0xff]   ;;  %v4281_v4 = vld [vmem:[#allocation5 + $0x68] ss:$16 sps:$4 sm:$0xff]   ;;  %v4282_v5 = vld [vmem:[#allocation5 + $0x44] ss:$16 sps:$4 sm:$0xff]  }
  0x95   : > { %491 = vmatprep.subr.bf16.mxu0 %v4276_v1  ;;  %532 = vmatprep.subr.bf16.mxu1 %v4278_v2  ;;  %v4284_v6 = vld [vmem:[#allocation5 + $0x4c] ss:$16 sps:$4 sm:$0xff]   ;;  %v4286_v7 = vld [vmem:[#allocation5 + $0x40] ss:$16 sps:$4 sm:$0xff]   ;;  %v4287_v8 = vld [vmem:[#allocation5 + $0x48] ss:$16 sps:$4 sm:$0xff]  }
  0x96   : > { %492 = vmatpush1.bf16.msra.mxu0 %v4280_v3  ;;  %533 = vmatpush1.bf16.msra.mxu1 %v4281_v4  ;;  %v4288_v9 = vld [vmem:[#allocation5 + $0x24] ss:$16 sps:$4 sm:$0xff]   ;;  %v4290_v10 = vld [vmem:[#allocation5 + $0x2c] ss:$16 sps:$4 sm:$0xff]   ;;  %v4292_v11 = vld [vmem:[#allocation5 + $0x20] ss:$16 sps:$4 sm:$0xff]  }
  0x97   : > { %493 = vmatprep.subr.bf16.mxu0 %v4282_v5  ;;  %534 = vmatprep.subr.bf16.mxu1 %v4284_v6  ;;  %v4293_v12 = vld [vmem:[#allocation5 + $0x28] ss:$16 sps:$4 sm:$0xff]   ;;  %v4294_v13 = vld [vmem:[#allocation5 + $0x4] ss:$16 sps:$4 sm:$0xff]   ;;  %v4296_v14 = vld [vmem:[#allocation5 + $0xc] ss:$16 sps:$4 sm:$0xff]  }
  0x98   : > { %v4298_v15 = vld [vmem:[#allocation5] ss:$16 sps:$4 sm:$0xff]   ;;  %v4299_v16 = vld [vmem:[#allocation5 + $0x8] ss:$16 sps:$4 sm:$0xff]   ;;  %v361_v17 = vld [vmem:[#allocation2] sm:$0xf] }
  0x99   : > { %v4302_v18 = vld [vmem:[#allocation7 + $0xe4] ss:$16 sps:$4 sm:$0xff]   ;;  %v366_v20 = vpack.c.bf16 %v361_v17, %v361_v17  ;;  %v4300_v21 = vld [vmem:[#allocation7 + $0xe0] ss:$16 sps:$4 sm:$0xff]   ;;  %vm479_vm0 = vcmask 523264   ;;  %vm569_vm1 = vcmask 1043456  }
  0x9a   : > { %494 = vmatpush1.bf16.msra.mxu0 %v4286_v7  ;;  %535 = vmatpush1.bf16.msra.mxu1 %v4287_v8  ;;  %v4305_v19 = vld [vmem:[#allocation7 + $0x2e4] ss:$16 sps:$4 sm:$0xff]   ;;  %v4303_v22 = vld [vmem:[#allocation7 + $0x2e0] ss:$16 sps:$4 sm:$0xff]   ;;  %s4176_s8 = smul.u32 7, %s5312_s11  ;;  %s3597_s16 = scalar_lea.sflag [#allocation4], %s5312_s11 }
  0x9b   : > { %495 = vmatprep.subr.bf16.mxu0 %v4288_v9  ;;  %536 = vmatprep.subr.bf16.mxu1 %v4290_v10  ;;  %v4308_v23 = vld [vmem:[#allocation7 + $0xc4] ss:$16 sps:$4 sm:$0xff]   ;;  %v4306_v25 = vld [vmem:[#allocation7 + $0xc0] ss:$16 sps:$4 sm:$0xff]   ;;  %s4177_s26 = smul.u32 28, %s5312_s11  ;;  %p5792_p8 = scmp.ne.s32.totalorder %s5773_s9, 0 }
  0x9c   : > { %v4311_v24 = vld [vmem:[#allocation7 + $0x2c4] ss:$16 sps:$4 sm:$0xff]   ;;  %v4309_v26 = vld [vmem:[#allocation7 + $0x2c0] ss:$16 sps:$4 sm:$0xff]   ;;  %s323_s28 = scalar_lea.vmem [#allocation11], %s4176_s8  ;;  %s4128_s0 = smul.u32 448, %s5137_s25 }
  0x9d   : > { %v4314_v27 = vld [vmem:[#allocation7 + $0xa4] ss:$16 sps:$4 sm:$0xff]   ;;  %v4312_v29 = vld [vmem:[#allocation7 + $0xa0] ss:$16 sps:$4 sm:$0xff]   ;;  %s5705_s18 = scalar_lea.vmem [#allocation12], %s4177_s26  ;;  %s5080_s13 = smov [#allocation12]  }
  0x9e   : > { %496 = vmatpush1.bf16.msra.mxu0 %v4292_v11  ;;  %537 = vmatpush1.bf16.msra.mxu1 %v4293_v12  ;;  %v4317_v28 = vld [vmem:[#allocation7 + $0x2a4] ss:$16 sps:$4 sm:$0xff]   ;;  %v4315_v30 = vld [vmem:[#allocation7 + $0x2a0] ss:$16 sps:$4 sm:$0xff]   ;;  %s3611_s14 = sshll.u32 %s5705_s18, 4  ;;  %s3609_s12 = scalar_lea.hbm %s5758_s6, %s4128_s0  ;;  %s3612_s14 = int_to_ptr.vmem [resolvable:$true] %s3611_s14 }
  0x9f   : > { %497 = vmatprep.subr.bf16.mxu0 %v4294_v13  ;;  %538 = vmatprep.subr.bf16.mxu1 %v4296_v14  ;;  %v4320_v31 = vld [vmem:[#allocation7 + $0x84] ss:$16 sps:$4 sm:$0xff]   ;;  %v4318_v33 = vld [vmem:[#allocation7 + $0x80] ss:$16 sps:$4 sm:$0xff]   ;;  %s4990_s17 = scalar_lea.vmem %s3612_s14, 448  ;;  %s4994_s19 = sshll.u32 %s5080_s13, 4  ;;  %s4995_s19 = int_to_ptr.vmem [resolvable:$false] %s4994_s19 }
  0xa0   : > { %v4323_v32 = vld [vmem:[#allocation7 + $0x284] ss:$16 sps:$4 sm:$0xff]   ;;  %v4321_v34 = vld [vmem:[#allocation7 + $0x280] ss:$16 sps:$4 sm:$0xff]   ;;  %p4991_p13 = scmp.ne.s32.totalorder %s3612_s14, %s4990_s17  ;;  %s4996_s25 = scalar_lea.vmem %s4995_s19, 896 }
  0xa1   : > { %v4326_v35 = vld [vmem:[#allocation7 + $0x64] ss:$16 sps:$4 sm:$0xff]   ;;  %v4324_v37 = vld [vmem:[#allocation7 + $0x60] ss:$16 sps:$4 sm:$0xff]   ;;  %p4997_p10 = scmp.lt.s32.totalorder %s3612_s14, %s4995_s19  ;;  %p4998_p1 = scmp.lt.s32.totalorder %s4996_s25, %s4990_s17 }
  0xa2   : > { %498 = vmatpush1.bf16.msra.mxu0 %v4298_v15  ;;  %539 = vmatpush1.bf16.msra.mxu1 %v4299_v16  ;;  %v4329_v36 = vld [vmem:[#allocation7 + $0x264] ss:$16 sps:$4 sm:$0xff]   ;;  %v4327_v38 = vld [vmem:[#allocation7 + $0x260] ss:$16 sps:$4 sm:$0xff]   ;;  %p4992_p5 = pnand %p4991_p13, %p5792_p8 }
  0xa3   : > { %1494 = vmatprep.subr.bf16.mxu0 %v4302_v18  ;;  %1535 = vmatprep.subr.bf16.mxu1 %v4305_v19  ;;  %v4332_v39 = vld [vmem:[#allocation7 + $0x44] ss:$16 sps:$4 sm:$0xff]   ;;  %v4330_v41 = vld [vmem:[#allocation7 + $0x40] ss:$16 sps:$4 sm:$0xff]   ;;  %v4398_v19 = vld [vmem:[#allocation7 + $0xec] ss:$16 sps:$4 sm:$0xff]   ;;  %p4999_p12 = por %p4998_p1, %p4997_p10 }
  0xa4   : > { %v4335_v40 = vld [vmem:[#allocation7 + $0x244] ss:$16 sps:$4 sm:$0xff]   ;;  %v4333_v42 = vld [vmem:[#allocation7 + $0x240] ss:$16 sps:$4 sm:$0xff]   ;;  %p4993_p9 = pneg %p4992_p5 }
  0xa5   : > { %3769 = vmatmul.mubr.msk.bf16.vlgmr.msra.gmra.mxu0 %vm479_vm0, %v366_v20  ;;  %3770 = vmatmul.mubr.msk.bf16.vlgmr.msra.gmra.mxu1 %vm479_vm0, %v366_v20  ;;  %v4338_v43 = vld [vmem:[#allocation7 + $0x24] ss:$16 sps:$4 sm:$0xff]   ;;  %v4336_v45 = vld [vmem:[#allocation7 + $0x20] ss:$16 sps:$4 sm:$0xff]   ;;  %v4401_v20 = vld [vmem:[#allocation7 + $0x2ec] ss:$16 sps:$4 sm:$0xff]  }
  0xa6   : > { %1495 = vmatpush1.bf16.msra.mxu0 %v4300_v21  ;;  %1536 = vmatpush1.bf16.msra.mxu1 %v4303_v22  ;;  %v4341_v44 = vld [vmem:[#allocation7 + $0x224] ss:$16 sps:$4 sm:$0xff]   ;;  %v4339_v46 = vld [vmem:[#allocation7 + $0x220] ss:$16 sps:$4 sm:$0xff]   ;;  %v383_v21 = vlaneseq  ;;  %p5000_p7 = pnand %p4999_p12, %p4993_p9 }
  0xa7   : > { %1496 = vmatprep.subr.bf16.mxu0 %v4308_v23  ;;  %1537 = vmatprep.subr.bf16.mxu1 %v4311_v24  ;;  %v4344_v47 = vld [vmem:[#allocation7 + $0x4] ss:$16 sps:$4 sm:$0xff]   ;;  %v4342_v49 = vld [vmem:[#allocation7] ss:$16 sps:$4 sm:$0xff]  }
  0xa8   : > { %v4347_v48 = vld [vmem:[#allocation7 + $0x204] ss:$16 sps:$4 sm:$0xff]   ;;  %v4345_v50 = vld [vmem:[#allocation7 + $0x200] ss:$16 sps:$4 sm:$0xff]   ;;  %v5321_v22 = vshrl.u32 %v383_v21, 7 }
  0xa9   : > { %v4350_v51 = vld [vmem:[#allocation7 + $0x1e4] ss:$16 sps:$4 sm:$0xff]   ;;  %v4348_v53 = vld [vmem:[#allocation7 + $0x1e0] ss:$16 sps:$4 sm:$0xff]  }
  0xaa   : > { %1497 = vmatpush1.bf16.msra.mxu0 %v4306_v25  ;;  %1538 = vmatpush1.bf16.msra.mxu1 %v4309_v26  ;;  %v4353_v52 = vld [vmem:[#allocation7 + $0x3e4] ss:$16 sps:$4 sm:$0xff]   ;;  %v4351_v54 = vld [vmem:[#allocation7 + $0x3e0] ss:$16 sps:$4 sm:$0xff]   ;;  %v5324_v23 = vsub.s32 0, %v5321_v22  ;;  %v5330_v26 = vld [vmem:[#allocation8 + $0x8] sm:$0xff] }
  0xab   : > { %1498 = vmatprep.subr.bf16.mxu0 %v4314_v27  ;;  %1539 = vmatprep.subr.bf16.mxu1 %v4317_v28  ;;  %v4356_v55 = vld [vmem:[#allocation7 + $0x1c4] ss:$16 sps:$4 sm:$0xff]   ;;  %v4354_v57 = vld [vmem:[#allocation7 + $0x1c0] ss:$16 sps:$4 sm:$0xff]   ;;  %v5332_v27 = vld [vmem:[#allocation8 + $0x18] sm:$0xff] }
  0xac   : > { %v4359_v56 = vld [vmem:[#allocation7 + $0x3c4] ss:$16 sps:$4 sm:$0xff]   ;;  %v4357_v58 = vld [vmem:[#allocation7 + $0x3c0] ss:$16 sps:$4 sm:$0xff]  }
  0xad   : > { %v4362_v59 = vld [vmem:[#allocation7 + $0x1a4] ss:$16 sps:$4 sm:$0xff]   ;;  %v4360_v61 = vld [vmem:[#allocation7 + $0x1a0] ss:$16 sps:$4 sm:$0xff]  }
  0xae   : > { %1499 = vmatpush1.bf16.msra.mxu0 %v4312_v29  ;;  %1540 = vmatpush1.bf16.msra.mxu1 %v4315_v30  ;;  %v4365_v60 = vld [vmem:[#allocation7 + $0x3a4] ss:$16 sps:$4 sm:$0xff]   ;;  %v4363_v62 = vld [vmem:[#allocation7 + $0x3a0] ss:$16 sps:$4 sm:$0xff]   ;;  %v390_v30 = vrot.slane %v5330_v26, %v5324_v23 }
  0xaf   : > { %1500 = vmatprep.subr.bf16.mxu0 %v4320_v31  ;;  %1541 = vmatprep.subr.bf16.mxu1 %v4323_v32  ;;  %v4368_v63 = vld [vmem:[#allocation7 + $0x184] ss:$16 sps:$4 sm:$0xff]   ;;  %v4366_v1 = vld [vmem:[#allocation7 + $0x180] ss:$16 sps:$4 sm:$0xff]   ;;  %v398_v31 = vrot.slane %v5332_v27, %v5324_v23 }
  0xb0   : > { %v4371_v0 = vld [vmem:[#allocation7 + $0x384] ss:$16 sps:$4 sm:$0xff]   ;;  %v4369_v2 = vld [vmem:[#allocation7 + $0x380] ss:$16 sps:$4 sm:$0xff]  }
  0xb1   : > { %v4374_v3 = vld [vmem:[#allocation7 + $0x164] ss:$16 sps:$4 sm:$0xff]   ;;  %v4372_v5 = vld [vmem:[#allocation7 + $0x160] ss:$16 sps:$4 sm:$0xff]  }
  0xb2   : > { %1501 = vmatpush1.bf16.msra.mxu0 %v4318_v33  ;;  %1542 = vmatpush1.bf16.msra.mxu1 %v4321_v34  ;;  %v4377_v4 = vld [vmem:[#allocation7 + $0x364] ss:$16 sps:$4 sm:$0xff]   ;;  %v4375_v6 = vld [vmem:[#allocation7 + $0x360] ss:$16 sps:$4 sm:$0xff]  }
  0xb3   : > { %1502 = vmatprep.subr.bf16.mxu0 %v4326_v35  ;;  %1543 = vmatprep.subr.bf16.mxu1 %v4329_v36  ;;  %v4380_v7 = vld [vmem:[#allocation7 + $0x144] ss:$16 sps:$4 sm:$0xff]   ;;  %v4378_v9 = vld [vmem:[#allocation7 + $0x140] ss:$16 sps:$4 sm:$0xff]  }
  0xb4   : > { %v4383_v8 = vld [vmem:[#allocation7 + $0x344] ss:$16 sps:$4 sm:$0xff]   ;;  %v4381_v10 = vld [vmem:[#allocation7 + $0x340] ss:$16 sps:$4 sm:$0xff]  }
  0xb5   : > { %v4386_v11 = vld [vmem:[#allocation7 + $0x124] ss:$16 sps:$4 sm:$0xff]   ;;  %v4384_v13 = vld [vmem:[#allocation7 + $0x120] ss:$16 sps:$4 sm:$0xff]  }
  0xb6   : > { %1503 = vmatpush1.bf16.msra.mxu0 %v4324_v37  ;;  %1544 = vmatpush1.bf16.msra.mxu1 %v4327_v38  ;;  %v4389_v12 = vld [vmem:[#allocation7 + $0x324] ss:$16 sps:$4 sm:$0xff]   ;;  %v4387_v14 = vld [vmem:[#allocation7 + $0x320] ss:$16 sps:$4 sm:$0xff]  }
  0xb7   : > { %1504 = vmatprep.subr.bf16.mxu0 %v4332_v39  ;;  %1545 = vmatprep.subr.bf16.mxu1 %v4335_v40  ;;  %v4390_v15 = vld [vmem:[#allocation7 + $0x100] ss:$16 sps:$4 sm:$0xff]   ;;  %v4392_v16 = vld [vmem:[#allocation7 + $0x104] ss:$16 sps:$4 sm:$0xff]  }
  0xb8   : > { %v4393_v17 = vld [vmem:[#allocation7 + $0x300] ss:$16 sps:$4 sm:$0xff]   ;;  %v4395_v18 = vld [vmem:[#allocation7 + $0x304] ss:$16 sps:$4 sm:$0xff]  }
  0xb9   : > { %v5326_v24 = vld [vmem:[#allocation8] sm:$0xff]  ;;  %v5328_v25 = vld [vmem:[#allocation8 + $0x10] sm:$0xff] }
  0xba   : > { %1505 = vmatpush1.bf16.msra.mxu0 %v4330_v41  ;;  %1546 = vmatpush1.bf16.msra.mxu1 %v4333_v42  ;;  %v386_v28 = vrot.slane %v5326_v24, %v5324_v23  ;;  %v394_v29 = vrot.slane %v5328_v25, %v5324_v23 }
  0xbb   : > { %1506 = vmatprep.subr.bf16.mxu0 %v4338_v43  ;;  %1547 = vmatprep.subr.bf16.mxu1 %v4341_v44 }
  0xbe   : > { %1507 = vmatpush1.bf16.msra.mxu0 %v4336_v45  ;;  %1548 = vmatpush1.bf16.msra.mxu1 %v4339_v46 }
  0xbf   : > { %1508 = vmatprep.subr.bf16.mxu0 %v4344_v47  ;;  %1549 = vmatprep.subr.bf16.mxu1 %v4347_v48 }
  0xc2   : > { %1509 = vmatpush1.bf16.msra.mxu0 %v4342_v49  ;;  %1550 = vmatpush1.bf16.msra.mxu1 %v4345_v50 }
  0xc3   : > { %1510 = vmatprep.subr.bf16.mxu0 %v4350_v51  ;;  %1551 = vmatprep.subr.bf16.mxu1 %v4353_v52 }
  0xc6   : > { %1511 = vmatpush2.bf16.msra.mxu0 %v4348_v53  ;;  %1552 = vmatpush2.bf16.msra.mxu1 %v4351_v54 }
  0xc7   : > { %1512 = vmatprep.subr.bf16.mxu0 %v4356_v55  ;;  %1553 = vmatprep.subr.bf16.mxu1 %v4359_v56 }
  0xca   : > { %1513 = vmatpush2.bf16.msra.mxu0 %v4354_v57  ;;  %1554 = vmatpush2.bf16.msra.mxu1 %v4357_v58 }
  0xcb   : > { %1514 = vmatprep.subr.bf16.mxu0 %v4362_v59  ;;  %1555 = vmatprep.subr.bf16.mxu1 %v4365_v60 }
  0xce   : > { %1515 = vmatpush2.bf16.msra.mxu0 %v4360_v61  ;;  %1556 = vmatpush2.bf16.msra.mxu1 %v4363_v62 }
  0xcf   : > { %1516 = vmatprep.subr.bf16.mxu0 %v4368_v63  ;;  %1557 = vmatprep.subr.bf16.mxu1 %v4371_v0 }
  0xd2   : > { %1517 = vmatpush2.bf16.msra.mxu0 %v4366_v1  ;;  %1558 = vmatpush2.bf16.msra.mxu1 %v4369_v2 }
  0xd3   : > { %1518 = vmatprep.subr.bf16.mxu0 %v4374_v3  ;;  %1559 = vmatprep.subr.bf16.mxu1 %v4377_v4 }
  0xd6   : > { %1519 = vmatpush2.bf16.msra.mxu0 %v4372_v5  ;;  %1560 = vmatpush2.bf16.msra.mxu1 %v4375_v6 }
  0xd7   : > { %1520 = vmatprep.subr.bf16.mxu0 %v4380_v7  ;;  %1561 = vmatprep.subr.bf16.mxu1 %v4383_v8 }
  0xda   : > { %1521 = vmatpush2.bf16.msra.mxu0 %v4378_v9  ;;  %1562 = vmatpush2.bf16.msra.mxu1 %v4381_v10 }
  0xdb   : > { %1522 = vmatprep.subr.bf16.mxu0 %v4386_v11  ;;  %1563 = vmatprep.subr.bf16.mxu1 %v4389_v12 }
  0xde   : > { %1523 = vmatpush2.bf16.msra.mxu0 %v4384_v13  ;;  %1564 = vmatpush2.bf16.msra.mxu1 %v4387_v14 }
  0xdf   : > { %1524 = vmatprep.subr.bf16.mxu0 %v4392_v16  ;;  %1565 = vmatprep.subr.bf16.mxu1 %v4395_v18 }
  0xe2   : > { %1525 = vmatpush2.bf16.msra.mxu0 %v4390_v15  ;;  %1566 = vmatpush2.bf16.msra.mxu1 %v4393_v17 }
  0xe3   : > { %1576 = vmatprep.subr.bf16.mxu0 %v4398_v19  ;;  %1617 = vmatprep.subr.bf16.mxu1 %v4401_v20 }
 0x165   : > { %v517_v32 = vpop.f32.mrf.mxu0  ;;  %v558_v33 = vpop.f32.mrf.mxu1 }
 0x166   : > { %v518_v34 = vadd.f32 %v517_v32, %v386_v28  ;;  %v559_v35 = vadd.f32 %v558_v33, %v394_v29 }
 0x167   : > { %v519_v36 = vpop.f32.mrf.mxu0  ;;  %v560_v37 = vpop.f32.mrf.mxu1 }
 0x168   : > { %v5342_v38 = vmax.f32 %v518_v34, 0.0  ;;  %v5344_v39 = vmax.f32 %v559_v35, 0.0  ;;  %v520_v40 = vadd.f32 %v519_v36, %v390_v30  ;;  %v561_v41 = vadd.f32 %v560_v37, %v398_v31 }
 0x169   : > { %v521_v42 = vpop.f32.mrf.mxu0  ;;  %v562_v43 = vpop.f32.mrf.mxu1 }
 0x16a   : > { %v570_v44 = vsel %vm569_vm1, %v5342_v38, 0.0  ;;  %v602_v45 = vmul.f32 %v5342_v38, %v5342_v38  ;;  %v584_v46 = vsel %vm569_vm1, %v5344_v39, 0.0  ;;  %v604_v47 = vmul.f32 %v5344_v39, %v5344_v39 }
 0x16b   : > { %v571_v48 = vrot.slane %v570_v44, 4  ;;  %v585_v49 = vrot.slane %v584_v46, 4  ;;  %v5354_v50 = vmax.f32 %v520_v40, 0.0  ;;  %v5356_v51 = vmax.f32 %v561_v41, 0.0  ;;  %v522_v52 = vpop.f32.mrf.mxu0  ;;  %v563_v53 = vpop.f32.mrf.mxu1 }
 0x16c   : > { %v606_v54 = vsel %vm569_vm1, %v602_v45, 0.0  ;;  %v620_v55 = vsel %vm569_vm1, %v604_v47, 0.0 }
 0x16d   : > { %v572_v56 = vadd.f32 %v571_v48, %v570_v44  ;;  %v607_v57 = vrot.slane %v606_v54, 4  ;;  %v586_v58 = vadd.f32 %v585_v49, %v584_v46  ;;  %v621_v59 = vrot.slane %v620_v55, 4 }
 0x16e   : > { %v577_v60 = vsel %vm569_vm1, %v5354_v50, 0.0  ;;  %v603_v61 = vmul.f32 %v5354_v50, %v5354_v50  ;;  %v591_v62 = vsel %vm569_vm1, %v5356_v51, 0.0  ;;  %v605_v63 = vmul.f32 %v5356_v51, %v5356_v51 }
 0x16f   : > { %v573_v0 = vrot.slane %v572_v56, 2  ;;  %v608_v1 = vadd.f32 %v607_v57, %v606_v54  ;;  %v587_v2 = vrot.slane %v586_v58, 2  ;;  %v622_v3 = vadd.f32 %v621_v59, %v620_v55 }
 0x170   : > { %v578_v4 = vrot.slane %v577_v60, 4  ;;  %v613_v5 = vsel %vm569_vm1, %v603_v61, 0.0  ;;  %v592_v6 = vrot.slane %v591_v62, 4  ;;  %v627_v7 = vsel %vm569_vm1, %v605_v63, 0.0 }
 0x171   : > { %v574_v8 = vadd.f32 %v573_v0, %v572_v56  ;;  %v609_v9 = vrot.slane %v608_v1, 2  ;;  %v588_v10 = vadd.f32 %v587_v2, %v586_v58  ;;  %v623_v11 = vrot.slane %v622_v3, 2 }
 0x172   : > { %v579_v12 = vadd.f32 %v578_v4, %v577_v60  ;;  %v614_v13 = vrot.slane %v613_v5, 4  ;;  %v593_v14 = vadd.f32 %v592_v6, %v591_v62  ;;  %v628_v15 = vrot.slane %v627_v7, 4 }
 0x173   : > { %v575_v16 = vrot.slane %v574_v8, 1  ;;  %v610_v17 = vadd.f32 %v609_v9, %v608_v1  ;;  %v589_v18 = vrot.slane %v588_v10, 1  ;;  %v624_v19 = vadd.f32 %v623_v11, %v622_v3 }
 0x174   : > { %v580_v20 = vrot.slane %v579_v12, 2  ;;  %v615_v21 = vadd.f32 %v614_v13, %v613_v5  ;;  %v594_v28 = vrot.slane %v593_v14, 2  ;;  %v629_v29 = vadd.f32 %v628_v15, %v627_v7 }
 0x175   : > { %v576_v30 = vadd.f32 %v575_v16, %v574_v8  ;;  %v611_v31 = vrot.slane %v610_v17, 1  ;;  %v590_v32 = vadd.f32 %v589_v18, %v588_v10  ;;  %v625_v33 = vrot.slane %v624_v19, 1 }
 0x176   : > { %v581_v34 = vadd.f32 %v580_v20, %v579_v12  ;;  %v616_v35 = vrot.slane %v615_v21, 2  ;;  %v595_v36 = vadd.f32 %v594_v28, %v593_v14  ;;  %v630_v37 = vrot.slane %v629_v29, 2 }
 0x177   : > { %v598_v40 = vmul.f32 0.25, %v576_v30  ;;  %v612_v41 = vadd.f32 %v611_v31, %v610_v17  ;;  %v600_v42 = vmul.f32 0.25, %v590_v32  ;;  %v626_v43 = vadd.f32 %v625_v33, %v624_v19 }
 0x178   : > { %v582_v44 = vrot.slane %v581_v34, 1  ;;  %v617_v45 = vadd.f32 %v616_v35, %v615_v21  ;;  %v596_v46 = vrot.slane %v595_v36, 1  ;;  %v631_v47 = vadd.f32 %v630_v37, %v629_v29 }
 0x179   : > { %v634_v48 = vmul.f32 0.25, %v612_v41  ;;  %v638_v49 = vmul.f32 %v598_v40, %v598_v40  ;;  %v636_v52 = vmul.f32 0.25, %v626_v43  ;;  %v640_v53 = vmul.f32 %v600_v42, %v600_v42 }
 0x17a   : > { %v583_v54 = vadd.f32 %v582_v44, %v581_v34  ;;  %v618_v55 = vrot.slane %v617_v45, 1  ;;  %v597_v57 = vadd.f32 %v596_v46, %v595_v36  ;;  %v632_v58 = vrot.slane %v631_v47, 1 }
 0x17b   : > { %v642_v56 = vsub.f32 %v634_v48, %v638_v49  ;;  %v644_v59 = vsub.f32 %v636_v52, %v640_v53  ;;  %v5371_v14 = vsub.s32 1, %v5321_v22  ;;  %v658_v15 = vsub.f32 %v5342_v38, %v598_v40  ;;  %v4396_v49 = vld [vmem:[#allocation7 + $0xe8] ss:$16 sps:$4 sm:$0xff]  }
 0x17c   : > { %v599_v60 = vmul.f32 0.25, %v583_v54  ;;  %v619_v61 = vadd.f32 %v618_v55, %v617_v45  ;;  %v601_v63 = vmul.f32 0.25, %v597_v57  ;;  %v633_v0 = vadd.f32 %v632_v58, %v631_v47  ;;  %v4399_v53 = vld [vmem:[#allocation7 + $0x2e8] ss:$16 sps:$4 sm:$0xff]   ;;  %v4407_v57 = vld [vmem:[#allocation7 + $0x2cc] ss:$16 sps:$4 sm:$0xff]  }
 0x17d   : > { %v646_v62 = vmax.f32 %v642_v56, 0.0  ;;  %v648_v1 = vmax.f32 %v644_v59, 0.0  ;;  %v660_v17 = vsub.f32 %v5344_v39, %v600_v42  ;;  %v669_v20 = vrot.slane %v5326_v24, %v5371_v14  ;;  %v4404_v56 = vld [vmem:[#allocation7 + $0xcc] ss:$16 sps:$4 sm:$0xff]   ;;  %v4402_v58 = vld [vmem:[#allocation7 + $0xc8] ss:$16 sps:$4 sm:$0xff]  }
 0x17e   : > { %v635_v2 = vmul.f32 0.25, %v619_v61  ;;  %v639_v3 = vmul.f32 %v599_v60, %v599_v60  ;;  %v637_v5 = vmul.f32 0.25, %v633_v0  ;;  %v641_v6 = vmul.f32 %v601_v63, %v601_v63  ;;  %v4405_v59 = vld [vmem:[#allocation7 + $0x2c8] ss:$16 sps:$4 sm:$0xff]   ;;  %v4413_v61 = vld [vmem:[#allocation7 + $0x2ac] ss:$16 sps:$4 sm:$0xff]  }
 0x17f   : > { %v650_v4 = vadd.f32 1e-05, %v646_v62  ;;  %v652_v7 = vadd.f32 1e-05, %v648_v1  ;;  %v5378_v21 = vsub.s32 2, %v5321_v22  ;;  %v677_v29 = vrot.slane %v5328_v25, %v5371_v14 }
 0x180   : > { %v643_v8 = vsub.f32 %v635_v2, %v639_v3  ;;  %v645_v9 = vsub.f32 %v637_v5, %v641_v6  ;;  %v659_v30 = vsub.f32 %v5354_v50, %v599_v60  ;;  %v673_v38 = vrot.slane %v5330_v26, %v5371_v14  ;;  %v4410_v60 = vld [vmem:[#allocation7 + $0xac] ss:$16 sps:$4 sm:$0xff]   ;;  %v4408_v62 = vld [vmem:[#allocation7 + $0xa8] ss:$16 sps:$4 sm:$0xff]  }
 0x181   : > { %4812 = vrsqrt.f32 %v650_v4  ;;  %v661_v39 = vsub.f32 %v5356_v51, %v601_v63  ;;  %v681_v33 = vrot.slane %v5332_v27, %v5371_v14  ;;  %v689_v34 = vrot.slane %v5326_v24, %v5378_v21  ;;  %v4411_v63 = vld [vmem:[#allocation7 + $0x2a8] ss:$16 sps:$4 sm:$0xff]   ;;  %v4416_v0 = vld [vmem:[#allocation7 + $0x8c] ss:$16 sps:$4 sm:$0xff]  }
 0x182   : > { %4814 = vrsqrt.f32 %v652_v7  ;;  %v647_v10 = vmax.f32 %v643_v8, 0.0  ;;  %v649_v11 = vmax.f32 %v645_v9, 0.0  ;;  %v693_v40 = vrot.slane %v5330_v26, %v5378_v21  ;;  %v4419_v1 = vld [vmem:[#allocation7 + $0x28c] ss:$16 sps:$4 sm:$0xff]   ;;  %v4414_v2 = vld [vmem:[#allocation7 + $0x88] ss:$16 sps:$4 sm:$0xff]  }
 0x183   : > { %v697_v50 = vrot.slane %v5328_v25, %v5378_v21  ;;  %v701_v42 = vrot.slane %v5332_v27, %v5378_v21  ;;  %v4417_v3 = vld [vmem:[#allocation7 + $0x288] ss:$16 sps:$4 sm:$0xff]   ;;  %v4422_v4 = vld [vmem:[#allocation7 + $0x6c] ss:$16 sps:$4 sm:$0xff]  }
 0x184   : > { %v651_v12 = vadd.f32 1e-05, %v647_v10  ;;  %v653_v13 = vadd.f32 1e-05, %v649_v11  ;;  %v4425_v5 = vld [vmem:[#allocation7 + $0x26c] ss:$16 sps:$4 sm:$0xff]  }
 0x185   : > { %v4420_v6 = vld [vmem:[#allocation7 + $0x68] ss:$16 sps:$4 sm:$0xff]   ;;  %v4428_v8 = vld [vmem:[#allocation7 + $0x4c] ss:$16 sps:$4 sm:$0xff]  }
 0x186   : > { %4816 = vrsqrt.f32 %v651_v12  ;;  %v4423_v7 = vld [vmem:[#allocation7 + $0x268] ss:$16 sps:$4 sm:$0xff]   ;;  %v4431_v9 = vld [vmem:[#allocation7 + $0x24c] ss:$16 sps:$4 sm:$0xff]  }
 0x187   : > { %4818 = vrsqrt.f32 %v653_v13  ;;  %v4426_v10 = vld [vmem:[#allocation7 + $0x48] ss:$16 sps:$4 sm:$0xff]   ;;  %v4434_v12 = vld [vmem:[#allocation7 + $0x2c] ss:$16 sps:$4 sm:$0xff]  }
 0x188   : > { %v4429_v11 = vld [vmem:[#allocation7 + $0x248] ss:$16 sps:$4 sm:$0xff]   ;;  %v4437_v13 = vld [vmem:[#allocation7 + $0x22c] ss:$16 sps:$4 sm:$0xff]  }
 0x18e   : > { %v4813_v16 = vpop.eup %4812 }
 0x18f   : > { %v4815_v18 = vpop.eup %4814  ;;  %v662_v19 = vmul.f32 %v4813_v16, %v658_v15  ;;  %v4432_v15 = vld [vmem:[#allocation7 + $0x28] ss:$16 sps:$4 sm:$0xff]  }
 0x190   : > { %v664_v28 = vmul.f32 %v4815_v18, %v660_v17  ;;  %v4435_v16 = vld [vmem:[#allocation7 + $0x228] ss:$16 sps:$4 sm:$0xff]   ;;  %v4440_v17 = vld [vmem:[#allocation7 + $0xc] ss:$16 sps:$4 sm:$0xff]  }
 0x191   : > { %v682_v32 = vmul.f32 %v669_v20, %v662_v19  ;;  %v4443_v18 = vld [vmem:[#allocation7 + $0x20c] ss:$16 sps:$4 sm:$0xff]   ;;  %v4438_v19 = vld [vmem:[#allocation7 + $0x8] ss:$16 sps:$4 sm:$0xff]  }
 0x192   : > { %v684_v36 = vmul.f32 %v677_v29, %v664_v28  ;;  %v4441_v20 = vld [vmem:[#allocation7 + $0x208] ss:$16 sps:$4 sm:$0xff]   ;;  %v4446_v28 = vld [vmem:[#allocation7 + $0x1ec] ss:$16 sps:$4 sm:$0xff]  }
 0x193   : > { %v4817_v31 = vpop.eup %4816  ;;  %v702_v44 = vadd.f32 %v689_v34, %v682_v32  ;;  %v4449_v29 = vld [vmem:[#allocation7 + $0x3ec] ss:$16 sps:$4 sm:$0xff]  }
 0x194   : > { %v4819_v35 = vpop.eup %4818  ;;  %v663_v37 = vmul.f32 %v4817_v31, %v659_v30  ;;  %v704_v46 = vadd.f32 %v697_v50, %v684_v36  ;;  %v4444_v30 = vld [vmem:[#allocation7 + $0x1e8] ss:$16 sps:$4 sm:$0xff]   ;;  %v4452_v31 = vld [vmem:[#allocation7 + $0x1cc] ss:$16 sps:$4 sm:$0xff]  }
 0x195   : > { %v665_v41 = vmul.f32 %v4819_v35, %v661_v39  ;;  %v5396_v54 = vpack.c.bf16 %v702_v44, %v702_v44  ;;  %v4455_v32 = vld [vmem:[#allocation7 + $0x3cc] ss:$16 sps:$4 sm:$0xff]   ;;  %v4450_v39 = vld [vmem:[#allocation7 + $0x1c8] ss:$16 sps:$4 sm:$0xff]  }
 0x196   : > { %v683_v51 = vmul.f32 %v673_v38, %v663_v37  ;;  %v5398_v55 = vpack.c.bf16 %v704_v46, %v704_v46  ;;  %v4447_v38 = vld [vmem:[#allocation7 + $0x3e8] ss:$16 sps:$4 sm:$0xff]   ;;  %v4458_v34 = vld [vmem:[#allocation7 + $0x1ac] ss:$16 sps:$4 sm:$0xff]  }
 0x197   : > { %v685_v43 = vmul.f32 %v681_v33, %v665_v41  ;;  %v4453_v33 = vld [vmem:[#allocation7 + $0x3c8] ss:$16 sps:$4 sm:$0xff]   ;;  %v4461_v35 = vld [vmem:[#allocation7 + $0x3ac] ss:$16 sps:$4 sm:$0xff]  }
 0x198   : > { %v703_v45 = vadd.f32 %v693_v40, %v683_v51  ;;  %v4456_v36 = vld [vmem:[#allocation7 + $0x1a8] ss:$16 sps:$4 sm:$0xff]   ;;  %v4464_v40 = vld [vmem:[#allocation7 + $0x18c] ss:$16 sps:$4 sm:$0xff]  }
 0x199   : > { %v705_v47 = vadd.f32 %v701_v42, %v685_v43  ;;  %v4459_v37 = vld [vmem:[#allocation7 + $0x3a8] ss:$16 sps:$4 sm:$0xff]   ;;  %v4467_v50 = vld [vmem:[#allocation7 + $0x38c] ss:$16 sps:$4 sm:$0xff]  }
 0x19a   : > { %v707_v48 = vpack.c.bf16 %v703_v45, %v703_v45  ;;  %v4462_v41 = vld [vmem:[#allocation7 + $0x188] ss:$16 sps:$4 sm:$0xff]   ;;  %v4470_v51 = vld [vmem:[#allocation7 + $0x16c] ss:$16 sps:$4 sm:$0xff]  }
 0x19b   : > { %v709_v52 = vpack.c.bf16 %v705_v47, %v705_v47  ;;  %v4465_v42 = vld [vmem:[#allocation7 + $0x388] ss:$16 sps:$4 sm:$0xff]   ;;  %v4473_v43 = vld [vmem:[#allocation7 + $0x36c] ss:$16 sps:$4 sm:$0xff]  }
 0x19c   : > { %1526 = vmatprep.mubr.bf16.mxu0 %v707_v48  ;;  %v4468_v44 = vld [vmem:[#allocation7 + $0x168] ss:$16 sps:$4 sm:$0xff]   ;;  %v4476_v46 = vld [vmem:[#allocation7 + $0x14c] ss:$16 sps:$4 sm:$0xff]  }
 0x19d   : > { %1567 = vmatprep.mubr.bf16.mxu1 %v709_v52  ;;  %1527 = vmatmul.mubr.bf16.vlgmr.msra.gmra.mxu0 %v5396_v54  ;;  %v4471_v45 = vld [vmem:[#allocation7 + $0x368] ss:$16 sps:$4 sm:$0xff]   ;;  %v4479_v47 = vld [vmem:[#allocation7 + $0x34c] ss:$16 sps:$4 sm:$0xff]  }
 0x19e   : > { %1568 = vmatmul.mubr.bf16.vlgmr.msra.gmra.mxu1 %v5398_v55  ;;  %1577 = vmatpush1.bf16.msra.mxu0 %v4396_v49  ;;  %v4477_v49 = vld [vmem:[#allocation7 + $0x348] ss:$16 sps:$4 sm:$0xff]  }
 0x19f   : > { %1618 = vmatpush1.bf16.msra.mxu1 %v4399_v53  ;;  %1608 = vmatprep.mubr.bf16.mxu0 %v707_v48  ;;  %v4474_v48 = vld [vmem:[#allocation7 + $0x148] ss:$16 sps:$4 sm:$0xff]   ;;  %v4485_v53 = vld [vmem:[#allocation7 + $0x32c] ss:$16 sps:$4 sm:$0xff]  }
 0x1a0   : > { %1649 = vmatprep.mubr.bf16.mxu1 %v709_v52  ;;  %1578 = vmatprep.subr.bf16.mxu0 %v4404_v56  ;;  %v4482_v52 = vld [vmem:[#allocation7 + $0x12c] ss:$16 sps:$4 sm:$0xff]   ;;  %v4480_v56 = vld [vmem:[#allocation7 + $0x128] ss:$16 sps:$4 sm:$0xff]  }
 0x1a1   : > { %1619 = vmatprep.subr.bf16.mxu1 %v4407_v57  ;;  %v4483_v57 = vld [vmem:[#allocation7 + $0x328] ss:$16 sps:$4 sm:$0xff]  }
 0x1a2   : > { %1579 = vmatpush1.bf16.msra.mxu0 %v4402_v58  ;;  %v4488_v58 = vld [vmem:[#allocation7 + $0x10c] ss:$16 sps:$4 sm:$0xff]  }
 0x1a3   : > { %1620 = vmatpush1.bf16.msra.mxu1 %v4405_v59  ;;  %1580 = vmatprep.subr.bf16.mxu0 %v4410_v60  ;;  %v4491_v59 = vld [vmem:[#allocation7 + $0x30c] ss:$16 sps:$4 sm:$0xff]   ;;  %v4486_v60 = vld [vmem:[#allocation7 + $0x108] ss:$16 sps:$4 sm:$0xff]  }
 0x1a4   : > { %1621 = vmatprep.subr.bf16.mxu1 %v4413_v61  ;;  %v4489_v61 = vld [vmem:[#allocation7 + $0x308] ss:$16 sps:$4 sm:$0xff]  }
 0x1a6   : > { %1581 = vmatpush1.bf16.msra.mxu0 %v4408_v62  ;;  %v4494_v62 = vld [vmem:[%s5315_s20 + $0x18c] ss:$28 sps:$4 sm:$0xff]  }
 0x1a7   : > { %1622 = vmatpush1.bf16.msra.mxu1 %v4411_v63  ;;  %1582 = vmatprep.subr.bf16.mxu0 %v4416_v0  ;;  %v4492_v63 = vld [vmem:[%s5315_s20 + $0x188] ss:$28 sps:$4 sm:$0xff]   ;;  %v4497_v0 = vld [vmem:[%s5315_s20 + $0x154] ss:$28 sps:$4 sm:$0xff]  }
 0x1a8   : > { %1623 = vmatprep.subr.bf16.mxu1 %v4419_v1  ;;  %v4495_v1 = vld [vmem:[%s5315_s20 + $0x150] ss:$28 sps:$4 sm:$0xff]  }
 0x1aa   : > { %1583 = vmatpush1.bf16.msra.mxu0 %v4414_v2  ;;  %v4500_v2 = vld [vmem:[%s5315_s20 + $0x11c] ss:$28 sps:$4 sm:$0xff]  }
 0x1ab   : > { %1624 = vmatpush1.bf16.msra.mxu1 %v4417_v3  ;;  %1584 = vmatprep.subr.bf16.mxu0 %v4422_v4  ;;  %v4498_v3 = vld [vmem:[%s5315_s20 + $0x118] ss:$28 sps:$4 sm:$0xff]   ;;  %v4503_v4 = vld [vmem:[%s5315_s20 + $0xe4] ss:$28 sps:$4 sm:$0xff]  }
 0x1ac   : > { %1625 = vmatprep.subr.bf16.mxu1 %v4425_v5  ;;  %v4501_v5 = vld [vmem:[%s5315_s20 + $0xe0] ss:$28 sps:$4 sm:$0xff]  }
 0x1ae   : > { %1585 = vmatpush1.bf16.msra.mxu0 %v4420_v6  ;;  %v4509_v6 = vld [vmem:[%s5315_s20 + $0x74] ss:$28 sps:$4 sm:$0xff]  }
 0x1af   : > { %1626 = vmatpush1.bf16.msra.mxu1 %v4423_v7  ;;  %1586 = vmatprep.subr.bf16.mxu0 %v4428_v8  ;;  %v4507_v7 = vld [vmem:[%s5315_s20 + $0x70] ss:$28 sps:$4 sm:$0xff]   ;;  %v4512_v8 = vld [vmem:[%s5315_s20 + $0x3c] ss:$28 sps:$4 sm:$0xff]  }
 0x1b0   : > { %1627 = vmatprep.subr.bf16.mxu1 %v4431_v9  ;;  %v4510_v9 = vld [vmem:[%s5315_s20 + $0x38] ss:$28 sps:$4 sm:$0xff]  }
 0x1b2   : > { %1587 = vmatpush1.bf16.msra.mxu0 %v4426_v10  ;;  %v4515_v10 = vld [vmem:[%s5315_s20 + $0x4] ss:$28 sps:$4 sm:$0xff]  }
 0x1b3   : > { %1628 = vmatpush1.bf16.msra.mxu1 %v4429_v11  ;;  %1588 = vmatprep.subr.bf16.mxu0 %v4434_v12  ;;  %v4513_v11 = vld [vmem:[%s5315_s20] ss:$28 sps:$4 sm:$0xff]   ;;  %v4518_v12 = vld [vmem:[%s5315_s20 + $0x34c] ss:$28 sps:$4 sm:$0xff]  }
 0x1b4   : > { %1629 = vmatprep.subr.bf16.mxu1 %v4437_v13  ;;  %v4516_v13 = vld [vmem:[%s5315_s20 + $0x348] ss:$28 sps:$4 sm:$0xff]  }
 0x1b6   : > { %1589 = vmatpush1.bf16.msra.mxu0 %v4432_v15  ;;  %v4521_v15 = vld [vmem:[%s5315_s20 + $0x314] ss:$28 sps:$4 sm:$0xff]  }
 0x1b7   : > { %1630 = vmatpush1.bf16.msra.mxu1 %v4435_v16  ;;  %1590 = vmatprep.subr.bf16.mxu0 %v4440_v17  ;;  %v4519_v16 = vld [vmem:[%s5315_s20 + $0x310] ss:$28 sps:$4 sm:$0xff]   ;;  %v4524_v17 = vld [vmem:[%s5315_s20 + $0x2dc] ss:$28 sps:$4 sm:$0xff]  }
 0x1b8   : > { %1631 = vmatprep.subr.bf16.mxu1 %v4443_v18  ;;  %v4522_v18 = vld [vmem:[%s5315_s20 + $0x2d8] ss:$28 sps:$4 sm:$0xff]  }
 0x1ba   : > { %1591 = vmatpush1.bf16.msra.mxu0 %v4438_v19  ;;  %v4527_v19 = vld [vmem:[%s5315_s20 + $0x2a4] ss:$28 sps:$4 sm:$0xff]  }
 0x1bb   : > { %1632 = vmatpush1.bf16.msra.mxu1 %v4441_v20  ;;  %1592 = vmatprep.subr.bf16.mxu0 %v4446_v28  ;;  %v4525_v20 = vld [vmem:[%s5315_s20 + $0x2a0] ss:$28 sps:$4 sm:$0xff]   ;;  %v4530_v28 = vld [vmem:[%s5315_s20 + $0x26c] ss:$28 sps:$4 sm:$0xff]  }
 0x1bc   : > { %1633 = vmatprep.subr.bf16.mxu1 %v4449_v29  ;;  %v4528_v29 = vld [vmem:[%s5315_s20 + $0x268] ss:$28 sps:$4 sm:$0xff]  }
 0x1be   : > { %1593 = vmatpush2.bf16.msra.mxu0 %v4444_v30  ;;  %v4533_v30 = vld [vmem:[%s5315_s20 + $0x234] ss:$28 sps:$4 sm:$0xff]  }
 0x1bf   : > { %1634 = vmatpush2.bf16.msra.mxu1 %v4447_v38  ;;  %1594 = vmatprep.subr.bf16.mxu0 %v4452_v31  ;;  %v4531_v38 = vld [vmem:[%s5315_s20 + $0x230] ss:$28 sps:$4 sm:$0xff]   ;;  %v4540_v31 = vld [vmem:[%s5315_s20 + $0x508] ss:$28 sps:$4 sm:$0xff]  }
 0x1c0   : > { %1635 = vmatprep.subr.bf16.mxu1 %v4455_v32  ;;  %v4536_v32 = vld [vmem:[%s5315_s20 + $0x1fc] ss:$28 sps:$4 sm:$0xff]  }
 0x1c2   : > { %1595 = vmatpush2.bf16.msra.mxu0 %v4450_v39  ;;  %v4542_v39 = vld [vmem:[%s5315_s20 + $0x50c] ss:$28 sps:$4 sm:$0xff]  }
 0x1c3   : > { %1636 = vmatpush2.bf16.msra.mxu1 %v4453_v33  ;;  %1596 = vmatprep.subr.bf16.mxu0 %v4458_v34  ;;  %v4534_v33 = vld [vmem:[%s5315_s20 + $0x1f8] ss:$28 sps:$4 sm:$0xff]   ;;  %v4539_v34 = vld [vmem:[%s5315_s20 + $0x1c4] ss:$28 sps:$4 sm:$0xff]  }
 0x1c4   : > { %1637 = vmatprep.subr.bf16.mxu1 %v4461_v35  ;;  %v4537_v35 = vld [vmem:[%s5315_s20 + $0x1c0] ss:$28 sps:$4 sm:$0xff]  }
 0x1c6   : > { %1597 = vmatpush2.bf16.msra.mxu0 %v4456_v36  ;;  %v4546_v36 = vld [vmem:[%s5315_s20 + $0x4d0] ss:$28 sps:$4 sm:$0xff]  }
 0x1c7   : > { %1638 = vmatpush2.bf16.msra.mxu1 %v4459_v37  ;;  %1598 = vmatprep.subr.bf16.mxu0 %v4464_v40  ;;  %v4548_v37 = vld [vmem:[%s5315_s20 + $0x4d4] ss:$28 sps:$4 sm:$0xff]  }
 0x1c8   : > { %1639 = vmatprep.subr.bf16.mxu1 %v4467_v50  ;;  %v4545_v40 = vld [vmem:[%s5315_s20 + $0x194] ss:$28 sps:$4 sm:$0xff]  }
 0x1c9   : > { %v4552_v50 = vld [vmem:[%s5315_s20 + $0x498] ss:$28 sps:$4 sm:$0xff]  }
 0x1ca   : > { %1599 = vmatpush2.bf16.msra.mxu0 %v4462_v41  ;;  %v4554_v41 = vld [vmem:[%s5315_s20 + $0x49c] ss:$28 sps:$4 sm:$0xff]  }
 0x1cb   : > { %1640 = vmatpush2.bf16.msra.mxu1 %v4465_v42  ;;  %1600 = vmatprep.subr.bf16.mxu0 %v4470_v51  ;;  %v4560_v42 = vld [vmem:[%s5315_s20 + $0x464] ss:$28 sps:$4 sm:$0xff]  }
 0x1cc   : > { %1641 = vmatprep.subr.bf16.mxu1 %v4473_v43  ;;  %v4558_v51 = vld [vmem:[%s5315_s20 + $0x460] ss:$28 sps:$4 sm:$0xff]   ;;  %v4566_v43 = vld [vmem:[%s5315_s20 + $0x42c] ss:$28 sps:$4 sm:$0xff]  }
 0x1ce   : > { %1601 = vmatpush2.bf16.msra.mxu0 %v4468_v44  ;;  %v4564_v44 = vld [vmem:[%s5315_s20 + $0x428] ss:$28 sps:$4 sm:$0xff]  }
 0x1cf   : > { %1642 = vmatpush2.bf16.msra.mxu1 %v4471_v45  ;;  %1602 = vmatprep.subr.bf16.mxu0 %v4476_v46  ;;  %v4572_v45 = vld [vmem:[%s5315_s20 + $0x3f4] ss:$28 sps:$4 sm:$0xff]  }
 0x1d0   : > { %1643 = vmatprep.subr.bf16.mxu1 %v4479_v47  ;;  %v4570_v46 = vld [vmem:[%s5315_s20 + $0x3f0] ss:$28 sps:$4 sm:$0xff]   ;;  %v4578_v47 = vld [vmem:[%s5315_s20 + $0x3bc] ss:$28 sps:$4 sm:$0xff]  }
 0x1d2   : > { %1603 = vmatpush2.bf16.msra.mxu0 %v4474_v48  ;;  %v4576_v48 = vld [vmem:[%s5315_s20 + $0x3b8] ss:$28 sps:$4 sm:$0xff]  }
 0x1d3   : > { %1644 = vmatpush2.bf16.msra.mxu1 %v4477_v49  ;;  %1604 = vmatprep.subr.bf16.mxu0 %v4482_v52  ;;  %v4584_v49 = vld [vmem:[%s5315_s20 + $0x384] ss:$28 sps:$4 sm:$0xff]  }
 0x1d4   : > { %1645 = vmatprep.subr.bf16.mxu1 %v4485_v53  ;;  %v4582_v52 = vld [vmem:[%s5315_s20 + $0x380] ss:$28 sps:$4 sm:$0xff]   ;;  %v4590_v53 = vld [vmem:[%s5315_s20 + $0x6cc] ss:$28 sps:$4 sm:$0xff]  }
 0x1d6   : > { %1605 = vmatpush2.bf16.msra.mxu0 %v4480_v56  ;;  %v4588_v56 = vld [vmem:[%s5315_s20 + $0x6c8] ss:$28 sps:$4 sm:$0xff]  }
 0x1d7   : > { %1646 = vmatpush2.bf16.msra.mxu1 %v4483_v57  ;;  %1606 = vmatprep.subr.bf16.mxu0 %v4488_v58  ;;  %v4596_v57 = vld [vmem:[%s5315_s20 + $0x694] ss:$28 sps:$4 sm:$0xff]  }
 0x1d8   : > { %1647 = vmatprep.subr.bf16.mxu1 %v4491_v59  ;;  %v4594_v58 = vld [vmem:[%s5315_s20 + $0x690] ss:$28 sps:$4 sm:$0xff]   ;;  %v4602_v59 = vld [vmem:[%s5315_s20 + $0x65c] ss:$28 sps:$4 sm:$0xff]  }
 0x1da   : > { %1607 = vmatpush2.bf16.msra.mxu0 %v4486_v60  ;;  %v4600_v60 = vld [vmem:[%s5315_s20 + $0x658] ss:$28 sps:$4 sm:$0xff]  }
 0x1db   : > { %1648 = vmatpush2.bf16.msra.mxu1 %v4489_v61  ;;  %3247 = vmatprep.subr.bf16.mxu0 %v4494_v62  ;;  %v4608_v61 = vld [vmem:[%s5315_s20 + $0x624] ss:$28 sps:$4 sm:$0xff]  }
 0x1dc   : > { %3288 = vmatprep.subr.bf16.mxu1 %v4542_v39  ;;  %v4606_v62 = vld [vmem:[%s5315_s20 + $0x620] ss:$28 sps:$4 sm:$0xff]  }
 0x1dd   : > { %1609 = vmatmul.mubr.bf16.vlgmr.msra.gmra.mxu0 %v5396_v54  ;;  %v4506_v54 = vld [vmem:[%s5315_s20 + $0xac] ss:$28 sps:$4 sm:$0xff]  }
 0x1de   : > { %1650 = vmatmul.mubr.bf16.vlgmr.msra.gmra.mxu1 %v5398_v55  ;;  %3248 = vmatpush1.bf16.msra.mxu0 %v4492_v63  ;;  %v4504_v55 = vld [vmem:[%s5315_s20 + $0xa8] ss:$28 sps:$4 sm:$0xff]  }
 0x1df   : > { %3249 = vmatprep.subr.bf16.mxu0 %v4497_v0  ;;  %3289 = vmatpush1.bf16.msra.mxu1 %v4540_v31  ;;  %v4614_v63 = vld [vmem:[%s5315_s20 + $0x5ec] ss:$28 sps:$4 sm:$0xff]  }
 0x1e0   : > { %3290 = vmatprep.subr.bf16.mxu1 %v4548_v37  ;;  %v4612_v0 = vld [vmem:[%s5315_s20 + $0x5e8] ss:$28 sps:$4 sm:$0xff]  }
 0x1e2   : > { %3250 = vmatpush1.bf16.msra.mxu0 %v4495_v1  ;;  %v4620_v1 = vld [vmem:[%s5315_s20 + $0x5b4] ss:$28 sps:$4 sm:$0xff]  }
 0x1e3   : > { %3251 = vmatprep.subr.bf16.mxu0 %v4500_v2  ;;  %3291 = vmatpush1.bf16.msra.mxu1 %v4546_v36  ;;  %v4618_v2 = vld [vmem:[%s5315_s20 + $0x5b0] ss:$28 sps:$4 sm:$0xff]  }
 0x1e4   : > { %3292 = vmatprep.subr.bf16.mxu1 %v4554_v41 }
 0x1e6   : > { %3252 = vmatpush1.bf16.msra.mxu0 %v4498_v3  ;;  %v4626_v3 = vld [vmem:[%s5315_s20 + $0x57c] ss:$28 sps:$4 sm:$0xff]  }
 0x1e7   : > { %3253 = vmatprep.subr.bf16.mxu0 %v4503_v4  ;;  %3293 = vmatpush1.bf16.msra.mxu1 %v4552_v50  ;;  %v4624_v4 = vld [vmem:[%s5315_s20 + $0x578] ss:$28 sps:$4 sm:$0xff]  }
 0x1e8   : > { %3294 = vmatprep.subr.bf16.mxu1 %v4560_v42 }
 0x1ea   : > { %3254 = vmatpush1.bf16.msra.mxu0 %v4501_v5  ;;  %v4630_v5 = vld [vmem:[%s5315_s20 + $0x540] ss:$28 sps:$4 sm:$0xff]  }
 0x1eb   : > { %3255 = vmatprep.subr.bf16.mxu0 %v4506_v54  ;;  %3295 = vmatpush1.bf16.msra.mxu1 %v4558_v51  ;;  %v4632_v54 = vld [vmem:[%s5315_s20 + $0x544] ss:$28 sps:$4 sm:$0xff]  }
 0x1ec   : > { %3296 = vmatprep.subr.bf16.mxu1 %v4566_v43 }
 0x1ee   : > { %3256 = vmatpush1.bf16.msra.mxu0 %v4504_v55  ;;  %v4638_v55 = vld [vmem:[%s5315_s20 + $0x514] ss:$28 sps:$4 sm:$0xff]  }
 0x1ef   : > { %3257 = vmatprep.subr.bf16.mxu0 %v4509_v6  ;;  %3297 = vmatpush1.bf16.msra.mxu1 %v4564_v44  ;;  %v5471_v6 = vsub.s32 3, %v5321_v22 }
 0x1f0   : > { %3298 = vmatprep.subr.bf16.mxu1 %v4572_v45 }
 0x1f2   : > { %3258 = vmatpush1.bf16.msra.mxu0 %v4507_v7  ;;  %v841_v7 = vrot.slane %v5326_v24, %v5471_v6 }
 0x1f3   : > { %3259 = vmatprep.subr.bf16.mxu0 %v4512_v8  ;;  %3299 = vmatpush1.bf16.msra.mxu1 %v4570_v46  ;;  %v845_v8 = vrot.slane %v5330_v26, %v5471_v6 }
 0x1f4   : > { %3300 = vmatprep.subr.bf16.mxu1 %v4578_v47 }
 0x1f6   : > { %3260 = vmatpush1.bf16.msra.mxu0 %v4510_v9 }
 0x1f7   : > { %3261 = vmatprep.subr.bf16.mxu0 %v4515_v10  ;;  %3301 = vmatpush1.bf16.msra.mxu1 %v4576_v48 }
 0x1f8   : > { %3302 = vmatprep.subr.bf16.mxu1 %v4584_v49 }
 0x1fa   : > { %3262 = vmatpush1.bf16.msra.mxu0 %v4513_v11 }
 0x1fb   : > { %3263 = vmatprep.subr.bf16.mxu0 %v4518_v12  ;;  %3303 = vmatpush1.bf16.msra.mxu1 %v4582_v52 }
 0x1fc   : > { %3304 = vmatprep.subr.bf16.mxu1 %v4590_v53 }
 0x1fe   : > { %3264 = vmatpush2.bf16.msra.mxu0 %v4516_v13 }
 0x1ff   : > { %3265 = vmatprep.subr.bf16.mxu0 %v4521_v15  ;;  %3305 = vmatpush2.bf16.msra.mxu1 %v4588_v56 }
 0x200   : > { %3306 = vmatprep.subr.bf16.mxu1 %v4596_v57 }
 0x202   : > { %3266 = vmatpush2.bf16.msra.mxu0 %v4519_v16 }
 0x203   : > { %3267 = vmatprep.subr.bf16.mxu0 %v4524_v17  ;;  %3307 = vmatpush2.bf16.msra.mxu1 %v4594_v58 }
 0x204   : > { %3308 = vmatprep.subr.bf16.mxu1 %v4602_v59 }
 0x206   : > { %3268 = vmatpush2.bf16.msra.mxu0 %v4522_v18 }
 0x207   : > { %3269 = vmatprep.subr.bf16.mxu0 %v4527_v19  ;;  %3309 = vmatpush2.bf16.msra.mxu1 %v4600_v60 }
 0x208   : > { %3310 = vmatprep.subr.bf16.mxu1 %v4608_v61 }
 0x20a   : > { %3270 = vmatpush2.bf16.msra.mxu0 %v4525_v20 }
 0x20b   : > { %3271 = vmatprep.subr.bf16.mxu0 %v4530_v28  ;;  %3311 = vmatpush2.bf16.msra.mxu1 %v4606_v62 }
 0x20c   : > { %3312 = vmatprep.subr.bf16.mxu1 %v4614_v63 }
 0x20e   : > { %3272 = vmatpush2.bf16.msra.mxu0 %v4528_v29 }
 0x20f   : > { %3273 = vmatprep.subr.bf16.mxu0 %v4533_v30  ;;  %3313 = vmatpush2.bf16.msra.mxu1 %v4612_v0 }
 0x210   : > { %3314 = vmatprep.subr.bf16.mxu1 %v4620_v1 }
 0x212   : > { %3274 = vmatpush2.bf16.msra.mxu0 %v4531_v38 }
 0x213   : > { %3275 = vmatprep.subr.bf16.mxu0 %v4536_v32  ;;  %3315 = vmatpush2.bf16.msra.mxu1 %v4618_v2 }
 0x214   : > { %3316 = vmatprep.subr.bf16.mxu1 %v4626_v3 }
 0x216   : > { %3276 = vmatpush2.bf16.msra.mxu0 %v4534_v33 }
 0x217   : > { %3277 = vmatprep.subr.bf16.mxu0 %v4539_v34  ;;  %3317 = vmatpush2.bf16.msra.mxu1 %v4624_v4 }
 0x218   : > { %3318 = vmatprep.subr.bf16.mxu1 %v4632_v54 }
 0x21a   : > { %3278 = vmatpush2.bf16.msra.mxu0 %v4537_v35 }
 0x21b   : > { %3329 = vmatprep.subr.bf16.mxu0 %v4545_v40  ;;  %3319 = vmatpush2.bf16.msra.mxu1 %v4630_v5 }
 0x21c   : > { %3370 = vmatprep.subr.bf16.mxu1 %v4638_v55 }
 0x25d   : > { %v1528_v9 = vpop.f32.mrf.mxu0 }
 0x25e   : > { %v1529_v10 = vadd.f32 %v1528_v9, %v841_v7  ;;  %v1569_v11 = vpop.f32.mrf.mxu1 }
 0x25f   : > { %v1530_v12 = vpop.f32.mrf.mxu0 }
 0x260   : > { %v1570_v13 = vadd.f32 %v1569_v11, %v1529_v10  ;;  %v1531_v15 = vadd.f32 %v1530_v12, %v845_v8  ;;  %v1571_v16 = vpop.f32.mrf.mxu1  ;;  %v5482_v10 = vsub.s32 4, %v5321_v22 }
 0x261   : > { %v1532_v17 = vpop.f32.mrf.mxu0 }
 0x262   : > { %v1658_v18 = vmax.f32 %v1570_v13, 0.0  ;;  %v1572_v19 = vadd.f32 %v1571_v16, %v1531_v15  ;;  %v1573_v20 = vpop.f32.mrf.mxu1  ;;  %v1761_v12 = vrot.slane %v5326_v24, %v5482_v10  ;;  %v5487_v13 = vsub.s32 5, %v5321_v22 }
 0x263   : > { %v1533_v28 = vpop.f32.mrf.mxu0 }
 0x264   : > { %v1662_v29 = vsel %vm569_vm1, %v1658_v18, 0.0  ;;  %v1694_v30 = vmul.f32 %v1658_v18, %v1658_v18  ;;  %v1659_v38 = vmax.f32 %v1572_v19, 0.0  ;;  %v1574_v31 = vpop.f32.mrf.mxu1  ;;  %v1765_v19 = vrot.slane %v5330_v26, %v5482_v10 }
 0x265   : > { %v1663_v32 = vrot.slane %v1662_v29, 4 }
 0x266   : > { %v1698_v39 = vsel %vm569_vm1, %v1694_v30, 0.0  ;;  %v1669_v33 = vsel %vm569_vm1, %v1659_v38, 0.0  ;;  %v1695_v34 = vmul.f32 %v1659_v38, %v1659_v38  ;;  %v1785_v30 = vrot.slane %v5330_v26, %v5487_v13  ;;  %v4557_v26 = vld [vmem:[%s5315_s20 + $0x124] ss:$28 sps:$4 sm:$0xff]  }
 0x267   : > { %v1664_v35 = vadd.f32 %v1663_v32, %v1662_v29  ;;  %v1699_v36 = vrot.slane %v1698_v39, 4  ;;  %v1670_v37 = vrot.slane %v1669_v33, 4 }
 0x268   : > { %v1705_v40 = vsel %vm569_vm1, %v1695_v34, 0.0 }
 0x269   : > { %v1665_v50 = vrot.slane %v1664_v35, 2  ;;  %v1700_v41 = vadd.f32 %v1699_v36, %v1698_v39  ;;  %v1671_v42 = vadd.f32 %v1670_v37, %v1669_v33  ;;  %v1706_v51 = vrot.slane %v1705_v40, 4  ;;  %v4543_v33 = vld [vmem:[%s5315_s20 + $0x190] ss:$28 sps:$4 sm:$0xff]   ;;  %v4555_v36 = vld [vmem:[%s5315_s20 + $0x120] ss:$28 sps:$4 sm:$0xff]  }
 0x26a   : > { %v849_v37 = vrot.slane %v5328_v25, %v5471_v6 }
 0x26b   : > { %v1666_v43 = vadd.f32 %v1665_v50, %v1664_v35  ;;  %v1701_v44 = vrot.slane %v1700_v41, 2  ;;  %v1672_v45 = vrot.slane %v1671_v42, 2  ;;  %v1707_v46 = vadd.f32 %v1706_v51, %v1705_v40  ;;  %v4551_v35 = vld [vmem:[%s5315_s20 + $0x15c] ss:$28 sps:$4 sm:$0xff]   ;;  %v4563_v40 = vld [vmem:[%s5315_s20 + $0xec] ss:$28 sps:$4 sm:$0xff]  }
 0x26c   : > { %v853_v50 = vrot.slane %v5332_v27, %v5471_v6  ;;  %v4567_v27 = vld [vmem:[%s5315_s20 + $0xb0] ss:$28 sps:$4 sm:$0xff]  }
 0x26d   : > { %v1667_v47 = vrot.slane %v1666_v43, 1  ;;  %v1702_v48 = vadd.f32 %v1701_v44, %v1700_v41  ;;  %v1673_v49 = vadd.f32 %v1672_v45, %v1671_v42  ;;  %v1708_v52 = vrot.slane %v1707_v46, 2  ;;  %v4569_v45 = vld [vmem:[%s5315_s20 + $0xb4] ss:$28 sps:$4 sm:$0xff]  }
 0x26f   : > { %v1668_v53 = vadd.f32 %v1667_v47, %v1666_v43  ;;  %v1703_v56 = vrot.slane %v1702_v48, 1  ;;  %v1674_v57 = vrot.slane %v1673_v49, 1  ;;  %v1709_v58 = vadd.f32 %v1708_v52, %v1707_v46  ;;  %v4561_v43 = vld [vmem:[%s5315_s20 + $0xe8] ss:$28 sps:$4 sm:$0xff]  }
 0x271   : > { %v1690_v59 = vmul.f32 0.25, %v1668_v53  ;;  %v1704_v60 = vadd.f32 %v1703_v56, %v1702_v48  ;;  %v1675_v61 = vadd.f32 %v1674_v57, %v1673_v49  ;;  %v1710_v62 = vrot.slane %v1709_v58, 1  ;;  %v4575_v57 = vld [vmem:[%s5315_s20 + $0x7c] ss:$28 sps:$4 sm:$0xff]  }
 0x273   : > { %v1726_v63 = vmul.f32 0.25, %v1704_v60  ;;  %v1730_v0 = vmul.f32 %v1690_v59, %v1690_v59  ;;  %v1691_v1 = vmul.f32 0.25, %v1675_v61  ;;  %v1711_v2 = vadd.f32 %v1710_v62, %v1709_v58 }
 0x274   : > { %v1750_v11 = vsub.f32 %v1658_v18, %v1690_v59  ;;  %v1781_v18 = vrot.slane %v5326_v24, %v5487_v13  ;;  %v4549_v24 = vld [vmem:[%s5315_s20 + $0x158] ss:$28 sps:$4 sm:$0xff]  }
 0x275   : > { %v1734_v3 = vsub.f32 %v1726_v63, %v1730_v0  ;;  %v1731_v4 = vmul.f32 %v1691_v1, %v1691_v1  ;;  %v1727_v5 = vmul.f32 0.25, %v1711_v2  ;;  %v1751_v17 = vsub.f32 %v1659_v38, %v1691_v1  ;;  %v4573_v2 = vld [vmem:[%s5315_s20 + $0x78] ss:$28 sps:$4 sm:$0xff]  }
 0x277   : > { %v1738_v54 = vmax.f32 %v1734_v3, 0.0  ;;  %v1735_v55 = vsub.f32 %v1727_v5, %v1731_v4 }
 0x279   : > { %v1742_v7 = vadd.f32 1e-05, %v1738_v54  ;;  %v1739_v8 = vmax.f32 %v1735_v55, 0.0  ;;  %v4581_v54 = vld [vmem:[%s5315_s20 + $0x44] ss:$28 sps:$4 sm:$0xff]  }
 0x27b   : > { %4820 = vrsqrt.f32 %v1742_v7  ;;  %v1743_v9 = vadd.f32 1e-05, %v1739_v8 }
 0x27d   : > { %4822 = vrsqrt.f32 %v1743_v9 }
 0x288   : > { %v4821_v15 = vpop.eup %4820 }
 0x289   : > { %v1754_v16 = vmul.f32 %v4821_v15, %v1750_v11 }
 0x28a   : > { %v4823_v20 = vpop.eup %4822 }
 0x28b   : > { %v1774_v28 = vmul.f32 %v1761_v12, %v1754_v16  ;;  %v1755_v29 = vmul.f32 %v4823_v20, %v1751_v17  ;;  %v4579_v12 = vld [vmem:[%s5315_s20 + $0x40] ss:$28 sps:$4 sm:$0xff]   ;;  %v4587_v20 = vld [vmem:[%s5315_s20 + $0xc] ss:$28 sps:$4 sm:$0xff]  }
 0x28d   : > { %v1775_v31 = vmul.f32 %v1765_v19, %v1755_v29  ;;  %v1794_v32 = vadd.f32 %v1781_v18, %v1774_v28 }
 0x28f   : > { %v1795_v39 = vadd.f32 %v1785_v30, %v1775_v31  ;;  %v5498_v34 = vpack.c.bf16 %v1794_v32, %v1794_v32  ;;  %v4585_v31 = vld [vmem:[%s5315_s20 + $0x8] ss:$28 sps:$4 sm:$0xff]  }
 0x291   : > { %v5495_v38 = vpack.c.bf16 %v1795_v39, %v1795_v39 }
 0x293   : > { %3279 = vmatprep.mubr.bf16.mxu0 %v5495_v38 }
 0x294   : > { %3280 = vmatmul.mubr.bf16.vlgmr.msra.gmra.mxu0 %v5498_v34 }
 0x295   : > { %3330 = vmatpush1.bf16.msra.mxu0 %v4543_v33  ;;  %3361 = vmatprep.mubr.bf16.mxu0 %v5495_v38 }
 0x296   : > { %3331 = vmatprep.subr.bf16.mxu0 %v4551_v35 }
 0x299   : > { %3332 = vmatpush1.bf16.msra.mxu0 %v4549_v24  ;;  %v4593_v24 = vld [vmem:[%s5315_s20 + $0x354] ss:$28 sps:$4 sm:$0xff]  }
 0x29a   : > { %3333 = vmatprep.subr.bf16.mxu0 %v4557_v26 }
 0x29d   : > { %v1610_v41 = vpop.f32.mrf.mxu0  ;;  %3334 = vmatpush1.bf16.msra.mxu0 %v4555_v36 }
 0x29e   : > { %v1611_v42 = vadd.f32 %v1610_v41, %v849_v37  ;;  %v1651_v51 = vpop.f32.mrf.mxu1  ;;  %3335 = vmatprep.subr.bf16.mxu0 %v4563_v40 }
 0x29f   : > { %v1612_v44 = vpop.f32.mrf.mxu0 }
 0x2a0   : > { %v1652_v46 = vadd.f32 %v1651_v51, %v1611_v42  ;;  %v1613_v47 = vadd.f32 %v1612_v44, %v853_v50  ;;  %v1653_v48 = vpop.f32.mrf.mxu1  ;;  %v4591_v50 = vld [vmem:[%s5315_s20 + $0x350] ss:$28 sps:$4 sm:$0xff]  }
 0x2a1   : > { %v1614_v49 = vpop.f32.mrf.mxu0  ;;  %3336 = vmatpush1.bf16.msra.mxu0 %v4561_v43  ;;  %v4599_v43 = vld [vmem:[%s5315_s20 + $0x31c] ss:$28 sps:$4 sm:$0xff]  }
 0x2a2   : > { %v5514_v25 = vmax.f32 %v1652_v46, 0.0  ;;  %v1654_v52 = vadd.f32 %v1653_v48, %v1613_v47  ;;  %v1655_v53 = vpop.f32.mrf.mxu1  ;;  %3337 = vmatprep.subr.bf16.mxu0 %v4569_v45  ;;  %v4597_v48 = vld [vmem:[%s5315_s20 + $0x318] ss:$28 sps:$4 sm:$0xff]  }
 0x2a3   : > { %v1615_v56 = vpop.f32.mrf.mxu0 }
 0x2a4   : > { %v1676_v58 = vsel %vm569_vm1, %v5514_v25, 0.0  ;;  %v1696_v59 = vmul.f32 %v5514_v25, %v5514_v25  ;;  %v5522_v60 = vmax.f32 %v1654_v52, 0.0  ;;  %v1656_v61 = vpop.f32.mrf.mxu1  ;;  %v4605_v52 = vld [vmem:[%s5315_s20 + $0x2e4] ss:$28 sps:$4 sm:$0xff]  }
 0x2a5   : > { %v1677_v62 = vrot.slane %v1676_v58, 4  ;;  %3338 = vmatpush1.bf16.msra.mxu0 %v4567_v27  ;;  %v4609_v61 = vld [vmem:[%s5315_s20 + $0x2a8] ss:$28 sps:$4 sm:$0xff]  }
 0x2a6   : > { %v1712_v63 = vsel %vm569_vm1, %v1696_v59, 0.0  ;;  %v1683_v0 = vsel %vm569_vm1, %v5522_v60, 0.0  ;;  %v1697_v1 = vmul.f32 %v5522_v60, %v5522_v60  ;;  %3339 = vmatprep.subr.bf16.mxu0 %v4575_v57  ;;  %v4603_v57 = vld [vmem:[%s5315_s20 + $0x2e0] ss:$28 sps:$4 sm:$0xff]  }
 0x2a7   : > { %v1678_v3 = vadd.f32 %v1677_v62, %v1676_v58  ;;  %v1713_v4 = vrot.slane %v1712_v63, 4  ;;  %v1684_v5 = vrot.slane %v1683_v0, 4  ;;  %v4611_v58 = vld [vmem:[%s5315_s20 + $0x2ac] ss:$28 sps:$4 sm:$0xff]   ;;  %v4617_v62 = vld [vmem:[%s5315_s20 + $0x274] ss:$28 sps:$4 sm:$0xff]  }
 0x2a8   : > { %v1719_v55 = vsel %vm569_vm1, %v1697_v1, 0.0  ;;  %v4621_v1 = vld [vmem:[%s5315_s20 + $0x238] ss:$28 sps:$4 sm:$0xff]  }
 0x2a9   : > { %v1679_v7 = vrot.slane %v1678_v3, 2  ;;  %v1714_v8 = vadd.f32 %v1713_v4, %v1712_v63  ;;  %v1685_v9 = vadd.f32 %v1684_v5, %v1683_v0  ;;  %v1720_v11 = vrot.slane %v1719_v55, 4  ;;  %3340 = vmatpush1.bf16.msra.mxu0 %v4573_v2  ;;  %v4615_v63 = vld [vmem:[%s5315_s20 + $0x270] ss:$28 sps:$4 sm:$0xff]   ;;  %v4623_v0 = vld [vmem:[%s5315_s20 + $0x23c] ss:$28 sps:$4 sm:$0xff]  }
 0x2aa   : > { %3341 = vmatprep.subr.bf16.mxu0 %v4581_v54  ;;  %v4629_v5 = vld [vmem:[%s5315_s20 + $0x204] ss:$28 sps:$4 sm:$0xff]  }
 0x2ab   : > { %v1680_v15 = vadd.f32 %v1679_v7, %v1678_v3  ;;  %v1715_v16 = vrot.slane %v1714_v8, 2  ;;  %v1686_v17 = vrot.slane %v1685_v9, 2  ;;  %v1721_v19 = vadd.f32 %v1720_v11, %v1719_v55  ;;  %v4828_v3 = vld [vmem:[#allocation8 + $0x10] sm:$0xff]  ;;  %v4627_v11 = vld [vmem:[%s5315_s20 + $0x200] ss:$28 sps:$4 sm:$0xff]  }
 0x2ac   : > { %v1769_v4 = vrot.slane %v4828_v3, %v5482_v10 }
 0x2ad   : > { %v1681_v28 = vrot.slane %v1680_v15, 1  ;;  %v1716_v18 = vadd.f32 %v1715_v16, %v1714_v8  ;;  %v1687_v29 = vadd.f32 %v1686_v17, %v1685_v9  ;;  %v1722_v30 = vrot.slane %v1721_v19, 2  ;;  %3342 = vmatpush1.bf16.msra.mxu0 %v4579_v12  ;;  %v4829_v8 = vld [vmem:[#allocation8 + $0x18] sm:$0xff] }
 0x2ae   : > { %3343 = vmatprep.subr.bf16.mxu0 %v4587_v20  ;;  %v1773_v9 = vrot.slane %v4829_v8, %v5482_v10  ;;  %v1789_v16 = vrot.slane %v4828_v3, %v5487_v13  ;;  %v4633_v20 = vld [vmem:[%s5315_s20 + $0x1c8] ss:$28 sps:$4 sm:$0xff]   ;;  %v4687_v3 = vld [vmem:[%s5315_s20 + $0x358] ss:$28 sps:$4 sm:$0xff]  }
 0x2af   : > { %v1682_v32 = vadd.f32 %v1681_v28, %v1680_v15  ;;  %v1717_v39 = vrot.slane %v1716_v18, 1  ;;  %v1688_v33 = vrot.slane %v1687_v29, 1  ;;  %v1723_v35 = vadd.f32 %v1722_v30, %v1721_v19 }
 0x2b0   : > { %v1793_v19 = vrot.slane %v4829_v8, %v5487_v13  ;;  %v4701_v8 = vld [vmem:[%s5315_s20 + $0x2ec] ss:$28 sps:$4 sm:$0xff]  }
 0x2b1   : > { %v1692_v26 = vmul.f32 0.25, %v1682_v32  ;;  %v1718_v36 = vadd.f32 %v1717_v39, %v1716_v18  ;;  %v1689_v37 = vadd.f32 %v1688_v33, %v1687_v29  ;;  %v1724_v40 = vrot.slane %v1723_v35, 1  ;;  %3344 = vmatpush1.bf16.msra.mxu0 %v4585_v31  ;;  %v4641_v18 = vld [vmem:[%s5315_s20 + $0x19c] ss:$28 sps:$4 sm:$0xff]   ;;  %v4636_v31 = vld [vmem:[%s5315_s20 + $0x510] ss:$28 sps:$4 sm:$0xff]  }
 0x2b2   : > { %3345 = vmatprep.subr.bf16.mxu0 %v4593_v24  ;;  %v4639_v39 = vld [vmem:[%s5315_s20 + $0x198] ss:$28 sps:$4 sm:$0xff]  }
 0x2b3   : > { %v1728_v41 = vmul.f32 0.25, %v1718_v36  ;;  %v1732_v42 = vmul.f32 %v1692_v26, %v1692_v26  ;;  %v1693_v51 = vmul.f32 0.25, %v1689_v37  ;;  %v1725_v44 = vadd.f32 %v1724_v40, %v1723_v35  ;;  %v4644_v33 = vld [vmem:[%s5315_s20 + $0x4dc] ss:$28 sps:$4 sm:$0xff]   ;;  %v4647_v35 = vld [vmem:[%s5315_s20 + $0x164] ss:$28 sps:$4 sm:$0xff]  }
 0x2b4   : > { %v1752_v2 = vsub.f32 %v5514_v25, %v1692_v26  ;;  %v4635_v25 = vld [vmem:[%s5315_s20 + $0x1cc] ss:$28 sps:$4 sm:$0xff]   ;;  %v4642_v24 = vld [vmem:[%s5315_s20 + $0x4d8] ss:$28 sps:$4 sm:$0xff]   ;;  %v4645_v26 = vld [vmem:[%s5315_s20 + $0x160] ss:$28 sps:$4 sm:$0xff]  }
 0x2b5   : > { %v1736_v45 = vsub.f32 %v1728_v41, %v1732_v42  ;;  %v1733_v46 = vmul.f32 %v1693_v51, %v1693_v51  ;;  %v1729_v47 = vmul.f32 0.25, %v1725_v44  ;;  %3346 = vmatpush2.bf16.msra.mxu0 %v4591_v50  ;;  %v1753_v7 = vsub.f32 %v5522_v60, %v1693_v51  ;;  %v4650_v36 = vld [vmem:[%s5315_s20 + $0x4a4] ss:$28 sps:$4 sm:$0xff]   ;;  %v4653_v37 = vld [vmem:[%s5315_s20 + $0x12c] ss:$28 sps:$4 sm:$0xff]  }
 0x2b6   : > { %3347 = vmatprep.subr.bf16.mxu0 %v4599_v43  ;;  %v4648_v40 = vld [vmem:[%s5315_s20 + $0x4a0] ss:$28 sps:$4 sm:$0xff]   ;;  %v4651_v50 = vld [vmem:[%s5315_s20 + $0x128] ss:$28 sps:$4 sm:$0xff]   ;;  %v4659_v42 = vld [vmem:[%s5315_s20 + $0xf4] ss:$28 sps:$4 sm:$0xff]  }
 0x2b7   : > { %v1740_v49 = vmax.f32 %v1736_v45, 0.0  ;;  %v1737_v53 = vsub.f32 %v1729_v47, %v1733_v46  ;;  %v4656_v41 = vld [vmem:[%s5315_s20 + $0x46c] ss:$28 sps:$4 sm:$0xff]   ;;  %v4662_v44 = vld [vmem:[%s5315_s20 + $0x434] ss:$28 sps:$4 sm:$0xff]  }
 0x2b8   : > { %v4654_v51 = vld [vmem:[%s5315_s20 + $0x468] ss:$28 sps:$4 sm:$0xff]   ;;  %v4657_v43 = vld [vmem:[%s5315_s20 + $0xf0] ss:$28 sps:$4 sm:$0xff]   ;;  %v4665_v45 = vld [vmem:[%s5315_s20 + $0xbc] ss:$28 sps:$4 sm:$0xff]  }
 0x2b9   : > { %v1744_v27 = vadd.f32 1e-05, %v1740_v49  ;;  %v1741_v56 = vmax.f32 %v1737_v53, 0.0  ;;  %3348 = vmatpush2.bf16.msra.mxu0 %v4597_v48  ;;  %v4660_v46 = vld [vmem:[%s5315_s20 + $0x430] ss:$28 sps:$4 sm:$0xff]  }
 0x2ba   : > { %3349 = vmatprep.subr.bf16.mxu0 %v4605_v52  ;;  %v4663_v47 = vld [vmem:[%s5315_s20 + $0xb8] ss:$28 sps:$4 sm:$0xff]   ;;  %v4671_v49 = vld [vmem:[%s5315_s20 + $0x84] ss:$28 sps:$4 sm:$0xff]  }
 0x2bb   : > { %4824 = vrsqrt.f32 %v1744_v27  ;;  %v1745_v59 = vadd.f32 1e-05, %v1741_v56  ;;  %v4668_v48 = vld [vmem:[%s5315_s20 + $0x3fc] ss:$28 sps:$4 sm:$0xff]   ;;  %v4674_v27 = vld [vmem:[%s5315_s20 + $0x3c4] ss:$28 sps:$4 sm:$0xff]  }
 0x2bc   : > { %v4666_v52 = vld [vmem:[%s5315_s20 + $0x3f8] ss:$28 sps:$4 sm:$0xff]   ;;  %v4669_v53 = vld [vmem:[%s5315_s20 + $0x80] ss:$28 sps:$4 sm:$0xff]   ;;  %v4677_v56 = vld [vmem:[%s5315_s20 + $0x4c] ss:$28 sps:$4 sm:$0xff]  }
 0x2bd   : > { %4826 = vrsqrt.f32 %v1745_v59  ;;  %3350 = vmatpush2.bf16.msra.mxu0 %v4603_v57  ;;  %v4672_v57 = vld [vmem:[%s5315_s20 + $0x3c0] ss:$28 sps:$4 sm:$0xff]   ;;  %v4680_v59 = vld [vmem:[%s5315_s20 + $0x38c] ss:$28 sps:$4 sm:$0xff]  }
 0x2be   : > { %3351 = vmatprep.subr.bf16.mxu0 %v4611_v58  ;;  %v4675_v58 = vld [vmem:[%s5315_s20 + $0x48] ss:$28 sps:$4 sm:$0xff]  }
 0x2c1   : > { %3352 = vmatpush2.bf16.msra.mxu0 %v4609_v61  ;;  %v4683_v61 = vld [vmem:[%s5315_s20 + $0x14] ss:$28 sps:$4 sm:$0xff]  }
 0x2c2   : > { %3353 = vmatprep.subr.bf16.mxu0 %v4617_v62  ;;  %v4678_v62 = vld [vmem:[%s5315_s20 + $0x388] ss:$28 sps:$4 sm:$0xff]  }
 0x2c5   : > { %3354 = vmatpush2.bf16.msra.mxu0 %v4615_v63  ;;  %v4681_v63 = vld [vmem:[%s5315_s20 + $0x10] ss:$28 sps:$4 sm:$0xff]  }
 0x2c6   : > { %3355 = vmatprep.subr.bf16.mxu0 %v4623_v0  ;;  %v4686_v0 = vld [vmem:[%s5315_s20 + $0x6d4] ss:$28 sps:$4 sm:$0xff]  }
 0x2c8   : > { %v4825_v54 = vpop.eup %4824 }
 0x2c9   : > { %v1756_v55 = vmul.f32 %v4825_v54, %v1752_v2  ;;  %3356 = vmatpush2.bf16.msra.mxu0 %v4621_v1  ;;  %v4689_v1 = vld [vmem:[%s5315_s20 + $0x35c] ss:$28 sps:$4 sm:$0xff]   ;;  %v4684_v2 = vld [vmem:[%s5315_s20 + $0x6d0] ss:$28 sps:$4 sm:$0xff]  }
 0x2ca   : > { %v4827_v12 = vpop.eup %4826  ;;  %3357 = vmatprep.subr.bf16.mxu0 %v4629_v5  ;;  %v4695_v5 = vld [vmem:[%s5315_s20 + $0x324] ss:$28 sps:$4 sm:$0xff]   ;;  %v4690_v54 = vld [vmem:[%s5315_s20 + $0x698] ss:$28 sps:$4 sm:$0xff]  }
 0x2cb   : > { %v1776_v15 = vmul.f32 %v1769_v4, %v1756_v55  ;;  %v1757_v17 = vmul.f32 %v4827_v12, %v1753_v7  ;;  %v4692_v4 = vld [vmem:[%s5315_s20 + $0x69c] ss:$28 sps:$4 sm:$0xff]   ;;  %v4698_v7 = vld [vmem:[%s5315_s20 + $0x664] ss:$28 sps:$4 sm:$0xff]   ;;  %v4704_v12 = vld [vmem:[%s5315_s20 + $0x62c] ss:$28 sps:$4 sm:$0xff]  }
 0x2cc   : > { %v4693_v55 = vld [vmem:[%s5315_s20 + $0x320] ss:$28 sps:$4 sm:$0xff]  }
 0x2cd   : > { %v1777_v60 = vmul.f32 %v1773_v9, %v1757_v17  ;;  %3358 = vmatpush2.bf16.msra.mxu0 %v4627_v11  ;;  %v1796_v28 = vadd.f32 %v1789_v16, %v1776_v15  ;;  %v4696_v9 = vld [vmem:[%s5315_s20 + $0x660] ss:$28 sps:$4 sm:$0xff]   ;;  %v4699_v11 = vld [vmem:[%s5315_s20 + $0x2e8] ss:$28 sps:$4 sm:$0xff]   ;;  %v4707_v15 = vld [vmem:[%s5315_s20 + $0x2b4] ss:$28 sps:$4 sm:$0xff]  }
 0x2ce   : > { %3359 = vmatprep.subr.bf16.mxu0 %v4635_v25  ;;  %v4702_v25 = vld [vmem:[%s5315_s20 + $0x628] ss:$28 sps:$4 sm:$0xff]   ;;  %v4705_v16 = vld [vmem:[%s5315_s20 + $0x2b0] ss:$28 sps:$4 sm:$0xff]  }
 0x2cf   : > { %v1797_v29 = vadd.f32 %v1793_v19, %v1777_v60  ;;  %v5561_v32 = vpack.c.bf16 %v1796_v28, %v1796_v28  ;;  %v4710_v17 = vld [vmem:[%s5315_s20 + $0x5f4] ss:$28 sps:$4 sm:$0xff]   ;;  %v4713_v19 = vld [vmem:[%s5315_s20 + $0x27c] ss:$28 sps:$4 sm:$0xff]  }
 0x2d0   : > { %v4708_v60 = vld [vmem:[%s5315_s20 + $0x5f0] ss:$28 sps:$4 sm:$0xff]   ;;  %v4716_v28 = vld [vmem:[%s5315_s20 + $0x5bc] ss:$28 sps:$4 sm:$0xff]  }
 0x2d1   : > { %3360 = vmatpush2.bf16.msra.mxu0 %v4633_v20  ;;  %v5558_v30 = vpack.c.bf16 %v1797_v29, %v1797_v29  ;;  %v4711_v20 = vld [vmem:[%s5315_s20 + $0x278] ss:$28 sps:$4 sm:$0xff]  }
 0x2d2   : > { %3411 = vmatprep.subr.bf16.mxu0 %v4641_v18  ;;  %v4719_v18 = vld [vmem:[%s5315_s20 + $0x244] ss:$28 sps:$4 sm:$0xff]   ;;  %v4714_v29 = vld [vmem:[%s5315_s20 + $0x5b8] ss:$28 sps:$4 sm:$0xff]  }
 0x2d3   : > { %3320 = vmatprep.mubr.bf16.mxu1 %v5558_v30 }
 0x2d4   : > { %3321 = vmatmul.mubr.bf16.vlgmr.msra.gmra.mxu1 %v5561_v32  ;;  %3362 = vmatmul.mubr.bf16.vlgmr.msra.gmra.mxu0 %v5498_v34 }
 0x2d5   : > { %3371 = vmatpush1.bf16.msra.mxu1 %v4636_v31  ;;  %3402 = vmatprep.mubr.bf16.mxu1 %v5558_v30  ;;  %v4717_v31 = vld [vmem:[%s5315_s20 + $0x240] ss:$28 sps:$4 sm:$0xff]  }
 0x2d6   : > { %3412 = vmatpush1.bf16.msra.mxu0 %v4639_v39  ;;  %3443 = vmatprep.mubr.bf16.mxu0 %v5495_v38  ;;  %v4722_v39 = vld [vmem:[%s5315_s20 + $0x584] ss:$28 sps:$4 sm:$0xff]  }
 0x2d7   : > { %3372 = vmatprep.subr.bf16.mxu1 %v4644_v33  ;;  %3413 = vmatprep.subr.bf16.mxu0 %v4647_v35  ;;  %v4725_v33 = vld [vmem:[%s5315_s20 + $0x20c] ss:$28 sps:$4 sm:$0xff]   ;;  %v4720_v35 = vld [vmem:[%s5315_s20 + $0x580] ss:$28 sps:$4 sm:$0xff]  }
 0x2d9   : > { %3373 = vmatpush1.bf16.msra.mxu1 %v4642_v24  ;;  %v4723_v24 = vld [vmem:[%s5315_s20 + $0x208] ss:$28 sps:$4 sm:$0xff]  }
 0x2da   : > { %3414 = vmatpush1.bf16.msra.mxu0 %v4645_v26  ;;  %3374 = vmatprep.subr.bf16.mxu1 %v4650_v36  ;;  %v4728_v26 = vld [vmem:[%s5315_s20 + $0x54c] ss:$28 sps:$4 sm:$0xff]   ;;  %v4731_v36 = vld [vmem:[%s5315_s20 + $0x1d4] ss:$28 sps:$4 sm:$0xff]  }
 0x2db   : > { %3415 = vmatprep.subr.bf16.mxu0 %v4653_v37  ;;  %v4726_v37 = vld [vmem:[%s5315_s20 + $0x548] ss:$28 sps:$4 sm:$0xff]  }
 0x2dd   : > { %3375 = vmatpush1.bf16.msra.mxu1 %v4648_v40  ;;  %v4729_v40 = vld [vmem:[%s5315_s20 + $0x1d0] ss:$28 sps:$4 sm:$0xff]  }
 0x2de   : > { %3416 = vmatpush1.bf16.msra.mxu0 %v4651_v50  ;;  %3376 = vmatprep.subr.bf16.mxu1 %v4656_v41  ;;  %v4734_v50 = vld [vmem:[%s5315_s20 + $0x51c] ss:$28 sps:$4 sm:$0xff]  }
 0x2df   : > { %3417 = vmatprep.subr.bf16.mxu0 %v4659_v42  ;;  %v4735_v41 = vld [vmem:[%s5315_s20 + $0x360] ss:$28 sps:$4 sm:$0xff]   ;;  %v4732_v42 = vld [vmem:[%s5315_s20 + $0x518] ss:$28 sps:$4 sm:$0xff]  }
 0x2e1   : > { %3377 = vmatpush1.bf16.msra.mxu1 %v4654_v51  ;;  %v4736_v51 = vld [vmem:[%s5315_s20 + $0x1a0] ss:$28 sps:$4 sm:$0xff]  }
 0x2e2   : > { %3418 = vmatpush1.bf16.msra.mxu0 %v4657_v43  ;;  %3378 = vmatprep.subr.bf16.mxu1 %v4662_v44  ;;  %v4739_v43 = vld [vmem:[%s5315_s20 + $0x4e4] ss:$28 sps:$4 sm:$0xff]  }
 0x2e3   : > { %3419 = vmatprep.subr.bf16.mxu0 %v4665_v45  ;;  %v4740_v44 = vld [vmem:[%s5315_s20 + $0x328] ss:$28 sps:$4 sm:$0xff]   ;;  %v4737_v45 = vld [vmem:[%s5315_s20 + $0x4e0] ss:$28 sps:$4 sm:$0xff]  }
 0x2e5   : > { %3379 = vmatpush1.bf16.msra.mxu1 %v4660_v46  ;;  %v4741_v46 = vld [vmem:[%s5315_s20 + $0x168] ss:$28 sps:$4 sm:$0xff]  }
 0x2e6   : > { %3420 = vmatpush1.bf16.msra.mxu0 %v4663_v47  ;;  %3380 = vmatprep.subr.bf16.mxu1 %v4668_v48  ;;  %v4744_v47 = vld [vmem:[%s5315_s20 + $0x4ac] ss:$28 sps:$4 sm:$0xff]  }
 0x2e7   : > { %3421 = vmatprep.subr.bf16.mxu0 %v4671_v49  ;;  %v4745_v48 = vld [vmem:[%s5315_s20 + $0x2f0] ss:$28 sps:$4 sm:$0xff]   ;;  %v4742_v49 = vld [vmem:[%s5315_s20 + $0x4a8] ss:$28 sps:$4 sm:$0xff]  }
 0x2e9   : > { %3381 = vmatpush1.bf16.msra.mxu1 %v4666_v52  ;;  %v4746_v52 = vld [vmem:[%s5315_s20 + $0x130] ss:$28 sps:$4 sm:$0xff]  }
 0x2ea   : > { %3422 = vmatpush1.bf16.msra.mxu0 %v4669_v53  ;;  %3382 = vmatprep.subr.bf16.mxu1 %v4674_v27  ;;  %v4749_v53 = vld [vmem:[%s5315_s20 + $0x474] ss:$28 sps:$4 sm:$0xff]  }
 0x2eb   : > { %3423 = vmatprep.subr.bf16.mxu0 %v4677_v56  ;;  %v4750_v27 = vld [vmem:[%s5315_s20 + $0x2b8] ss:$28 sps:$4 sm:$0xff]  }
 0x2ec   : > { %v4751_v56 = vld [vmem:[%s5315_s20 + $0xf8] ss:$28 sps:$4 sm:$0xff]  }
 0x2ed   : > { %3383 = vmatpush1.bf16.msra.mxu1 %v4672_v57  ;;  %v4754_v57 = vld [vmem:[%s5315_s20 + $0x43c] ss:$28 sps:$4 sm:$0xff]  }
 0x2ee   : > { %3424 = vmatpush1.bf16.msra.mxu0 %v4675_v58  ;;  %3384 = vmatprep.subr.bf16.mxu1 %v4680_v59  ;;  %v4755_v58 = vld [vmem:[%s5315_s20 + $0x280] ss:$28 sps:$4 sm:$0xff]   ;;  %v4752_v59 = vld [vmem:[%s5315_s20 + $0x438] ss:$28 sps:$4 sm:$0xff]  }
 0x2ef   : > { %3425 = vmatprep.subr.bf16.mxu0 %v4683_v61  ;;  %v4756_v61 = vld [vmem:[%s5315_s20 + $0xc0] ss:$28 sps:$4 sm:$0xff]  }
 0x2f1   : > { %3385 = vmatpush1.bf16.msra.mxu1 %v4678_v62  ;;  %v4759_v62 = vld [vmem:[%s5315_s20 + $0x404] ss:$28 sps:$4 sm:$0xff]  }
 0x2f2   : > { %3426 = vmatpush1.bf16.msra.mxu0 %v4681_v63  ;;  %3386 = vmatprep.subr.bf16.mxu1 %v4686_v0  ;;  %v4760_v63 = vld [vmem:[%s5315_s20 + $0x248] ss:$28 sps:$4 sm:$0xff]   ;;  %v4757_v0 = vld [vmem:[%s5315_s20 + $0x400] ss:$28 sps:$4 sm:$0xff]  }
 0x2f3   : > { %3427 = vmatprep.subr.bf16.mxu0 %v4689_v1  ;;  %v4761_v1 = vld [vmem:[%s5315_s20 + $0x88] ss:$28 sps:$4 sm:$0xff]  }
 0x2f5   : > { %3387 = vmatpush2.bf16.msra.mxu1 %v4684_v2  ;;  %v4764_v2 = vld [vmem:[%s5315_s20 + $0x3cc] ss:$28 sps:$4 sm:$0xff]  }
 0x2f6   : > { %3428 = vmatpush2.bf16.msra.mxu0 %v4687_v3  ;;  %3388 = vmatprep.subr.bf16.mxu1 %v4692_v4  ;;  %v4765_v3 = vld [vmem:[%s5315_s20 + $0x210] ss:$28 sps:$4 sm:$0xff]   ;;  %v4762_v4 = vld [vmem:[%s5315_s20 + $0x3c8] ss:$28 sps:$4 sm:$0xff]  }
 0x2f7   : > { %3429 = vmatprep.subr.bf16.mxu0 %v4695_v5  ;;  %v4766_v5 = vld [vmem:[%s5315_s20 + $0x50] ss:$28 sps:$4 sm:$0xff]  }
 0x2f9   : > { %3389 = vmatpush2.bf16.msra.mxu1 %v4690_v54  ;;  %v4769_v54 = vld [vmem:[%s5315_s20 + $0x394] ss:$28 sps:$4 sm:$0xff]  }
 0x2fa   : > { %3430 = vmatpush2.bf16.msra.mxu0 %v4693_v55  ;;  %3390 = vmatprep.subr.bf16.mxu1 %v4698_v7  ;;  %v4770_v55 = vld [vmem:[%s5315_s20 + $0x1d8] ss:$28 sps:$4 sm:$0xff]   ;;  %v4767_v7 = vld [vmem:[%s5315_s20 + $0x390] ss:$28 sps:$4 sm:$0xff]  }
 0x2fb   : > { %3431 = vmatprep.subr.bf16.mxu0 %v4701_v8  ;;  %v4771_v8 = vld [vmem:[%s5315_s20 + $0x18] ss:$28 sps:$4 sm:$0xff]  }
 0x2fd   : > { %3391 = vmatpush2.bf16.msra.mxu1 %v4696_v9  ;;  %v4774_v9 = vld [vmem:[%s5315_s20 + $0x6dc] ss:$28 sps:$4 sm:$0xff]  }
 0x2fe   : > { %3432 = vmatpush2.bf16.msra.mxu0 %v4699_v11  ;;  %3392 = vmatprep.subr.bf16.mxu1 %v4704_v12  ;;  %v4772_v11 = vld [vmem:[%s5315_s20 + $0x6d8] ss:$28 sps:$4 sm:$0xff]   ;;  %v4777_v12 = vld [vmem:[%s5315_s20 + $0x6a4] ss:$28 sps:$4 sm:$0xff]  }
 0x2ff   : > { %3433 = vmatprep.subr.bf16.mxu0 %v4707_v15  ;;  %v4775_v15 = vld [vmem:[%s5315_s20 + $0x6a0] ss:$28 sps:$4 sm:$0xff]  }
 0x301   : > { %3393 = vmatpush2.bf16.msra.mxu1 %v4702_v25  ;;  %v4780_v25 = vld [vmem:[%s5315_s20 + $0x66c] ss:$28 sps:$4 sm:$0xff]  }
 0x302   : > { %3434 = vmatpush2.bf16.msra.mxu0 %v4705_v16  ;;  %3394 = vmatprep.subr.bf16.mxu1 %v4710_v17  ;;  %v4778_v16 = vld [vmem:[%s5315_s20 + $0x668] ss:$28 sps:$4 sm:$0xff]   ;;  %v4783_v17 = vld [vmem:[%s5315_s20 + $0x634] ss:$28 sps:$4 sm:$0xff]  }
 0x303   : > { %3435 = vmatprep.subr.bf16.mxu0 %v4713_v19  ;;  %v4781_v19 = vld [vmem:[%s5315_s20 + $0x630] ss:$28 sps:$4 sm:$0xff]  }
 0x305   : > { %3395 = vmatpush2.bf16.msra.mxu1 %v4708_v60  ;;  %v4786_v60 = vld [vmem:[%s5315_s20 + $0x5fc] ss:$28 sps:$4 sm:$0xff]  }
 0x306   : > { %3436 = vmatpush2.bf16.msra.mxu0 %v4711_v20  ;;  %3396 = vmatprep.subr.bf16.mxu1 %v4716_v28  ;;  %v4784_v20 = vld [vmem:[%s5315_s20 + $0x5f8] ss:$28 sps:$4 sm:$0xff]   ;;  %v4787_v28 = vld [vmem:[%s5315_s20 + $0x5c0] ss:$28 sps:$4 sm:$0xff]  }
 0x307   : > { %3437 = vmatprep.subr.bf16.mxu0 %v4719_v18  ;;  %v4792_v18 = vld [vmem:[%s5315_s20 + $0x58c] ss:$28 sps:$4 sm:$0xff]  }
 0x309   : > { %3397 = vmatpush2.bf16.msra.mxu1 %v4714_v29  ;;  %v4790_v29 = vld [vmem:[%s5315_s20 + $0x588] ss:$28 sps:$4 sm:$0xff]  }
 0x30a   : > { %3438 = vmatpush2.bf16.msra.mxu0 %v4717_v31  ;;  %3398 = vmatprep.subr.bf16.mxu1 %v4722_v39  ;;  %v4795_v31 = vld [vmem:[%s5315_s20 + $0x554] ss:$28 sps:$4 sm:$0xff]  }
 0x30b   : > { %3439 = vmatprep.subr.bf16.mxu0 %v4725_v33  ;;  %v4793_v39 = vld [vmem:[%s5315_s20 + $0x550] ss:$28 sps:$4 sm:$0xff]   ;;  %v4796_v33 = vld [vmem:[%s5315_s20 + $0x6e0] ss:$28 sps:$4 sm:$0xff]  }
 0x30d   : > { %3399 = vmatpush2.bf16.msra.mxu1 %v4720_v35  ;;  %v4797_v35 = vld [vmem:[%s5315_s20 + $0x520] ss:$28 sps:$4 sm:$0xff]  }
 0x30e   : > { %3440 = vmatpush2.bf16.msra.mxu0 %v4723_v24  ;;  %3400 = vmatprep.subr.bf16.mxu1 %v4728_v26  ;;  %v4798_v24 = vld [vmem:[%s5315_s20 + $0x6a8] ss:$28 sps:$4 sm:$0xff]  }
 0x30f   : > { %3441 = vmatprep.subr.bf16.mxu0 %v4731_v36  ;;  %v4799_v36 = vld [vmem:[%s5315_s20 + $0x4e8] ss:$28 sps:$4 sm:$0xff]  }
 0x311   : > { %3401 = vmatpush2.bf16.msra.mxu1 %v4726_v37 }
 0x312   : > { %3442 = vmatpush2.bf16.msra.mxu0 %v4729_v40  ;;  %3452 = vmatprep.subr.bf16.mxu1 %v4734_v50  ;;  %v4800_v40 = vld [vmem:[%s5315_s20 + $0x670] ss:$28 sps:$4 sm:$0xff]  }
 0x313   : > { %4129 = vmatprep.subr.bf16.mxu0 %v4735_v41  ;;  %v4801_v41 = vld [vmem:[%s5315_s20 + $0x4b0] ss:$28 sps:$4 sm:$0xff]  }
 0x314   : > { %3403 = vmatmul.mubr.bf16.vlgmr.msra.gmra.mxu1 %v5561_v32 }
 0x315   : > { %3444 = vmatmul.mubr.bf16.vlgmr.msra.gmra.mxu0 %v5498_v34  ;;  %3453 = vmatpush1.bf16.msra.mxu1 %v4732_v42 }
 0x316   : > { %3484 = vmatprep.mubr.bf16.mxu1 %v5558_v30  ;;  %4130 = vmatpush3.bf16.msra.mxu0 %v4736_v51  ;;  %v4802_v51 = vld [vmem:[%s5315_s20 + $0x638] ss:$28 sps:$4 sm:$0xff]  }
 0x317   : > { %3525 = vmatprep.mubr.bf16.mxu0 %v5495_v38  ;;  %3454 = vmatprep.subr.bf16.mxu1 %v4739_v43  ;;  %v4747_v38 = vld [vmem:[%s5315_s20 + $0x470] ss:$28 sps:$4 sm:$0xff]   ;;  %v4803_v43 = vld [vmem:[%s5315_s20 + $0x478] ss:$28 sps:$4 sm:$0xff]  }
 0x318   : > { %4131 = vmatprep.subr.bf16.mxu0 %v4740_v44  ;;  %v4805_v44 = vld [vmem:[%s5315_s20 + $0x440] ss:$28 sps:$4 sm:$0xff]  }
 0x319   : > { %3455 = vmatpush1.bf16.msra.mxu1 %v4737_v45  ;;  %v4806_v45 = vld [vmem:[%s5315_s20 + $0x5c8] ss:$28 sps:$4 sm:$0xff]  }
 0x31a   : > { %4132 = vmatpush3.bf16.msra.mxu0 %v4741_v46  ;;  %3456 = vmatprep.subr.bf16.mxu1 %v4744_v47  ;;  %v4807_v46 = vld [vmem:[%s5315_s20 + $0x408] ss:$28 sps:$4 sm:$0xff]   ;;  %v4808_v47 = vld [vmem:[%s5315_s20 + $0x590] ss:$28 sps:$4 sm:$0xff]  }
 0x31b   : > { %4133 = vmatprep.subr.bf16.mxu0 %v4745_v48  ;;  %v4809_v48 = vld [vmem:[%s5315_s20 + $0x3d0] ss:$28 sps:$4 sm:$0xff]  }
 0x31d   : > { %3457 = vmatpush1.bf16.msra.mxu1 %v4742_v49  ;;  %v4810_v49 = vld [vmem:[%s5315_s20 + $0x558] ss:$28 sps:$4 sm:$0xff]  }
 0x31e   : > { %4134 = vmatpush3.bf16.msra.mxu0 %v4746_v52  ;;  %3458 = vmatprep.subr.bf16.mxu1 %v4749_v53  ;;  %v4811_v52 = vld [vmem:[%s5315_s20 + $0x398] ss:$28 sps:$4 sm:$0xff]   ;;  %v2058_v53 = vld [vmem:[%s323_s28] sm:$0xff] }
 0x31f   : > { %4135 = vmatprep.subr.bf16.mxu0 %v4750_v27  ;;  %v2063_v27 = vrot.slane %v2058_v53, %v5324_v23  ;;  %v2071_v23 = vrot.slane %v2058_v53, %v5378_v21 }
 0x321   : > { %3459 = vmatpush1.bf16.msra.mxu1 %v4747_v38  ;;  %v2067_v38 = vrot.slane %v2058_v53, %v5371_v14  ;;  %v2075_v14 = vrot.slane %v2058_v53, %v5471_v6 }
 0x322   : > { %4136 = vmatpush3.bf16.msra.mxu0 %v4751_v56  ;;  %3460 = vmatprep.subr.bf16.mxu1 %v4754_v57 }
 0x323   : > { %4137 = vmatprep.subr.bf16.mxu0 %v4755_v58 }
 0x325   : > { %3461 = vmatpush1.bf16.msra.mxu1 %v4752_v59 }
 0x326   : > { %4138 = vmatpush3.bf16.msra.mxu0 %v4756_v61  ;;  %3462 = vmatprep.subr.bf16.mxu1 %v4759_v62 }
 0x327   : > { %4139 = vmatprep.subr.bf16.mxu0 %v4760_v63 }
 0x329   : > { %3463 = vmatpush1.bf16.msra.mxu1 %v4757_v0 }
 0x32a   : > { %4140 = vmatpush3.bf16.msra.mxu0 %v4761_v1  ;;  %3464 = vmatprep.subr.bf16.mxu1 %v4764_v2 }
 0x32b   : > { %4141 = vmatprep.subr.bf16.mxu0 %v4765_v3 }
 0x32d   : > { %3465 = vmatpush1.bf16.msra.mxu1 %v4762_v4 }
 0x32e   : > { %4142 = vmatpush3.bf16.msra.mxu0 %v4766_v5  ;;  %3466 = vmatprep.subr.bf16.mxu1 %v4769_v54 }
 0x32f   : > { %4143 = vmatprep.subr.bf16.mxu0 %v4770_v55 }
 0x331   : > { %3467 = vmatpush1.bf16.msra.mxu1 %v4767_v7 }
 0x332   : > { %4144 = vmatpush3.bf16.msra.mxu0 %v4771_v8  ;;  %3468 = vmatprep.subr.bf16.mxu1 %v4774_v9 }
 0x335   : > { %3469 = vmatpush2.bf16.msra.mxu1 %v4772_v11  ;;  %3526 = vmatmul.mubr.bf16.vlgmr.msra.gmra.mxu0 %v5498_v34  ;;  %v4789_v34 = vld [vmem:[%s5315_s20 + $0x5c4] ss:$28 sps:$4 sm:$0xff]  }
 0x336   : > { %3470 = vmatprep.subr.bf16.mxu1 %v4777_v12 }
 0x339   : > { %3471 = vmatpush2.bf16.msra.mxu1 %v4775_v15 }
 0x33a   : > { %3472 = vmatprep.subr.bf16.mxu1 %v4780_v25 }
 0x33d   : > { %3473 = vmatpush2.bf16.msra.mxu1 %v4778_v16 }
 0x33e   : > { %3474 = vmatprep.subr.bf16.mxu1 %v4783_v17 }
 0x341   : > { %3475 = vmatpush2.bf16.msra.mxu1 %v4781_v19 }
 0x342   : > { %3476 = vmatprep.subr.bf16.mxu1 %v4786_v60 }
 0x345   : > { %3477 = vmatpush2.bf16.msra.mxu1 %v4784_v20 }
 0x346   : > { %3478 = vmatprep.subr.bf16.mxu1 %v4789_v34 }
 0x349   : > { %3479 = vmatpush2.bf16.msra.mxu1 %v4787_v28 }
 0x34a   : > { %3480 = vmatprep.subr.bf16.mxu1 %v4792_v18 }
 0x34d   : > { %3481 = vmatpush2.bf16.msra.mxu1 %v4790_v29 }
 0x34e   : > { %3482 = vmatprep.subr.bf16.mxu1 %v4795_v31  ;;  %v2079_v31 = vrot.slane %v2058_v53, %v5482_v10 }
 0x351   : > { %3483 = vmatpush2.bf16.msra.mxu1 %v4793_v39  ;;  %v2083_v39 = vrot.slane %v2058_v53, %v5487_v13 }
 0x352   : > { %4151 = vmatprep.subr.bf16.mxu1 %v4796_v33 }
 0x354   : > { %3485 = vmatmul.mubr.bf16.vlgmr.msra.gmra.mxu1 %v5561_v32  ;;  %v3281_v26 = vpop.f32.mrf.mxu0 }
 0x355   : > { %4152 = vmatpush3.bf16.msra.mxu1 %v4797_v35  ;;  %3565 = vmatprep.mubr.bf16.mxu1 %v5558_v30  ;;  %v4804_v30 = vld [vmem:[%s5315_s20 + $0x600] ss:$28 sps:$4 sm:$0xff]   ;;  %v3282_v56 = vadd.f32 %v3281_v26, %v2063_v27 }
 0x356   : > { %v3283_v37 = vpop.f32.mrf.mxu0  ;;  %4153 = vmatprep.subr.bf16.mxu1 %v4798_v24 }
 0x357   : > { %v3284_v59 = vadd.f32 %v3283_v37, %v2067_v38 }
 0x358   : > { %v3285_v50 = vpop.f32.mrf.mxu0 }
 0x359   : > { %4154 = vmatpush3.bf16.msra.mxu1 %v4799_v36 }
 0x35a   : > { %v3286_v42 = vpop.f32.mrf.mxu0  ;;  %4155 = vmatprep.subr.bf16.mxu1 %v4800_v40 }
 0x35d   : > { %4156 = vmatpush3.bf16.msra.mxu1 %v4801_v41 }
 0x35e   : > { %4157 = vmatprep.subr.bf16.mxu1 %v4802_v51 }
 0x361   : > { %4158 = vmatpush3.bf16.msra.mxu1 %v4803_v43  ;;  %v2086_v43 = vsub.s32 6, %v5321_v22 }
 0x362   : > { %4159 = vmatprep.subr.bf16.mxu1 %v4804_v30 }
 0x363   : > { %v2087_v10 = vrot.slane %v2058_v53, %v2086_v43 }
 0x365   : > { %4160 = vmatpush3.bf16.msra.mxu1 %v4805_v44 }
 0x366   : > { %4161 = vmatprep.subr.bf16.mxu1 %v4806_v45 }
 0x369   : > { %4162 = vmatpush3.bf16.msra.mxu1 %v4807_v46 }
 0x36a   : > { %4163 = vmatprep.subr.bf16.mxu1 %v4808_v47 }
 0x36d   : > { %4164 = vmatpush3.bf16.msra.mxu1 %v4809_v48 }
 0x36e   : > { %4165 = vmatprep.subr.bf16.mxu1 %v4810_v49 }
 0x371   : > { %4166 = vmatpush3.bf16.msra.mxu1 %v4811_v52 }
 0x374   : > { %3566 = vmatmul.mubr.bf16.vlgmr.msra.gmra.mxu1 %v5561_v32 }
 0x394   : > { %v3322_v57 = vpop.f32.mrf.mxu1  ;;  %v3363_v58 = vpop.f32.mrf.mxu0 }
 0x395   : > { %v3323_v61 = vadd.f32 %v3322_v57, %v3282_v56  ;;  %v3364_v55 = vadd.f32 %v3363_v58, %v2071_v23 }
 0x396   : > { %v3324_v62 = vpop.f32.mrf.mxu1  ;;  %v3365_v63 = vpop.f32.mrf.mxu0 }
 0x397   : > { %v3325_v0 = vadd.f32 %v3324_v62, %v3284_v59  ;;  %v3573_v3 = vmax.f32 %v3323_v61, 0.0  ;;  %v3366_v8 = vadd.f32 %v3365_v63, %v2075_v14 }
 0x398   : > { %v3326_v1 = vpop.f32.mrf.mxu1  ;;  %v3367_v2 = vpop.f32.mrf.mxu0 }
 0x399   : > { %v3574_v32 = vmax.f32 %v3325_v0, 0.0 }
 0x39a   : > { %v3327_v4 = vpop.f32.mrf.mxu1  ;;  %v3368_v5 = vpop.f32.mrf.mxu0 }
 0x39b   : > { %v3586_v54 = vcombine.low %v3573_v3, %v3574_v32 }
 0x39d   : > { %3592 = vst [vmem:[%s5705_s18] sm:$0xff] %v3586_v54 }
 0x3d4   : > { %v3404_v7 = vpop.f32.mrf.mxu1 }
 0x3d5   : > { %v3405_v9 = vadd.f32 %v3404_v7, %v3364_v55  ;;  %v3445_v11 = vpop.f32.mrf.mxu0 }
 0x3d6   : > { %v3406_v12 = vpop.f32.mrf.mxu1  ;;  %v3446_v33 = vadd.f32 %v3445_v11, %v2079_v31 }
 0x3d7   : > { %v3407_v15 = vadd.f32 %v3406_v12, %v3366_v8  ;;  %v3447_v25 = vpop.f32.mrf.mxu0  ;;  %v3575_v17 = vmax.f32 %v3405_v9, 0.0 }
 0x3d8   : > { %v3408_v16 = vpop.f32.mrf.mxu1  ;;  %v3448_v24 = vadd.f32 %v3447_v25, %v2083_v39 }
 0x3d9   : > { %v3576_v19 = vmax.f32 %v3407_v15, 0.0  ;;  %v3449_v60 = vpop.f32.mrf.mxu0 }
 0x3da   : > { %v3409_v20 = vpop.f32.mrf.mxu1 }
 0x3db   : > { %v3587_v34 = vcombine.low %v3575_v17, %v3576_v19  ;;  %v3450_v28 = vpop.f32.mrf.mxu0 }
 0x3dd   : > { %3593 = vst [vmem:[%s5705_s18 + $0x8] sm:$0xff] %v3587_v34 }
 0x3f5   : > { %v4145_v21 = vpop.f32.mrf.mxu0 }
 0x3f7   : > { %v4146_v18 = vpop.f32.mrf.mxu0 }
 0x3f8   : > { %v4147_v13 = vadd.f32 %v4146_v18, %v4145_v21 }
 0x3f9   : > { %v4148_v6 = vpop.f32.mrf.mxu0 }
 0x3fa   : > { %v3528_v45 = vadd.f32 %v4147_v13, %v2087_v10 }
 0x3fb   : > { %v4149_v29 = vpop.f32.mrf.mxu0 }
 0x414   : > { %v3486_v35 = vpop.f32.mrf.mxu1 }
 0x415   : > { %v3487_v26 = vadd.f32 %v3486_v35, %v3446_v33 }
 0x416   : > { %v3488_v36 = vpop.f32.mrf.mxu1 }
 0x417   : > { %v3489_v37 = vadd.f32 %v3488_v36, %v3448_v24  ;;  %v3577_v50 = vmax.f32 %v3487_v26, 0.0 }
 0x418   : > { %v3490_v40 = vpop.f32.mrf.mxu1 }
 0x419   : > { %v3578_v41 = vmax.f32 %v3489_v37, 0.0 }
 0x41a   : > { %v3491_v42 = vpop.f32.mrf.mxu1 }
 0x41b   : > { %v3588_v51 = vcombine.low %v3577_v50, %v3578_v41 }
 0x41d   : > { %3594 = vst [vmem:[%s5705_s18 + $0x10] sm:$0xff] %v3588_v51 }
 0x434   : > { %v4167_v30 = vpop.f32.mrf.mxu1 }
 0x436   : > { %v4168_v44 = vpop.f32.mrf.mxu1 }
 0x437   : > { %v4169_v46 = vadd.f32 %v4168_v44, %v4167_v30 }
 0x438   : > { %v4170_v47 = vpop.f32.mrf.mxu1 }
 0x439   : > { %v3568_v48 = vadd.f32 %v4169_v46, %v3528_v45 }
 0x43a   : > { %v4171_v49 = vpop.f32.mrf.mxu1 }
 0x43b   : > { %v3579_v52 = vmax.f32 %v3568_v48, 0.0 }
 0x43d   : > { %3595 = vst [vmem:[%s5705_s18 + $0x18] sm:$0xf] %v3579_v52 }
 0x43e   : > { %5003 = shalt.err (!%p5000_p7)
}
 0x43f   : > { %s5004_s29 = scalar_lea.hbm %s3609_s12, 448  ;;  %s5008_s15 = scalar_lea.hbm %s5758_s6, 896 }
 0x440   : > { %p5005_p11 = scmp.ne.s32.totalorder %s3609_s12, %s5004_s29  ;;  %p5009_p4 = scmp.lt.s32.totalorder %s3609_s12, %s5758_s6 }
 0x441   : > { %p5010_p3 = scmp.lt.s32.totalorder %s5008_s15, %s5004_s29 }
 0x442   : > { %p5006_p6 = pnand %p5005_p11, %p5792_p8 }
 0x443   : > { %p5011_p0 = por %p5010_p3, %p5009_p4 }
 0x444   : > { %p5007_p2 = pneg %p5006_p6 }
 0x446   : > { %p5012_p13 = pnand %p5011_p0, %p5007_p2 }
 0x448   : > { %5015 = shalt.err (!%p5012_p13)
}
 0x449   : > { %4198 = dma.vmem_to_hbm [thread:$0]  (%p5792_p8), %s3612_s14, 448, %s3609_s12, %s3597_s16  }
 0x44a PF: > { %s5793_s8 = sld [smem:[#allocation20_spill]]  ;;  %s3623_s28 = sand.u32 1, %s5054_s21  }
 0x44b   : > { %p5795_p9 = scmp.ge.s32.totalorder %s5066_s24, 2  ;;  %s3624_s26 = scalar_lea.sflag [#allocation4], %s3623_s28 }
 0x450   : > { %p5794_p5 = scmp.ne.s32.totalorder %s5793_s8, 0 }
 0x452   : > { %p4221_p10 = pnand %p5795_p9, %p5794_p5 }
 0x454   : > { %p4222_p1 = pneg %p4221_p10 }
 0x456   : > { %5049 = dma.done.wait (%p4222_p1), %s3624_s26, 448  }
 0x457   : > { %5051 = vsyncadd (%p4222_p1), %s3624_s26, 4294966848  ;;  %s5796_s24 = sld [smem:[#allocation18_spill]]  ;;  %s5798_s21 = smov %s5058_s22 }
 0x458   : > { %s5797_s18 = sld [smem:[#allocation19_spill]]  ;;  %s5799_s22 = smov %s5062_s23 }
 0x45d   : > { %p19_p12 = scmp.ge.s32.totalorder %s5796_s24, 4  }
 0x45e   : > { %s5800_s23 = smov %s5797_s18 }
 0x45f   :  { %21 = sbr.rel (!%p19_p12) target bundleno = 8 (0x8), region = 115 }
 0x464   :  { %3629 = vsyncpa [#allocation3], 1 }
 0x465   :  { %3631 = vsyncpa [#allocation3 + $0x1], 1 }
 0x466   :  { %3632 = vsyncpa [#allocation6], 1 }
 0x467   :  { %3633 = vsyncpa [#allocation9], 1 }
 0x468   :  { %3634 = vsyncpa [#allocation4], 1 }
 0x469   :  { %3636 = vsyncpa [#allocation4 + $0x1], 1 }

</bundles_post_ra>
